<compile_context>
chip_gen: v6e
topology: v6e:2x2x1
jax: 0.10.0
libtpu: 0.0.40
codegen_flags: <defaults>
</compile_context>

<pallas_src>
import functools

import jax
import jax.numpy as jnp
from jax.experimental import pallas as pl
from jax.experimental.pallas import tpu as pltpu

_VMEM_LIMIT = 32 * 1024 * 1024  # safe on v5e / v6e / v7x scoped-VMEM budgets


# ----------------------------------------------------------------------------
# In-kernel helpers
# ----------------------------------------------------------------------------
def _first_conv(w1cols, xn):
    """h1 = W1p @ xn with tiny K (= C): VPU broadcast-FMA instead of an MXU
    matmul whose contraction dim would be 2-4 (avoids >95% MXU underfill).

    w1cols: (C, F, 1) value (column c of the folded weight as an (F,1) slab)
    xn    : (C, T)    value
    returns (F, T)
    """
    acc = w1cols[0] * xn[0:1, :]
    for ch in range(1, xn.shape[0]):
        acc = acc + w1cols[ch] * xn[ch:ch + 1, :]
    return acc


def _is_first_step():
    return (pl.program_id(0) == 0) & (pl.program_id(1) == 0)


# ----------------------------------------------------------------------------
# Pass A: per-channel sum / sumsq of x (outer ActNorm DDI statistics)
# ----------------------------------------------------------------------------
def _channel_stats_kernel(x_ref, sum_ref, sumsq_ref):
    @pl.when(_is_first_step())
    def _init():
        sum_ref[...] = jnp.zeros_like(sum_ref)
        sumsq_ref[...] = jnp.zeros_like(sumsq_ref)

    x = x_ref[...]                                        # (C, T)
    sum_ref[...] += jnp.sum(x, axis=1, keepdims=True)
    sumsq_ref[...] += jnp.sum(x * x, axis=1, keepdims=True)


# ----------------------------------------------------------------------------
# Pass B: sum / sumsq of h1 = W1p @ actnorm(x)   (coupling ActNorm #1 stats)
# ----------------------------------------------------------------------------
def _h1_stats_kernel(x_ref, a0_ref, b0_ref, w1_ref, sum_ref, sumsq_ref):
    @pl.when(_is_first_step())
    def _init():
        sum_ref[...] = jnp.zeros_like(sum_ref)
        sumsq_ref[...] = jnp.zeros_like(sumsq_ref)

    xn = x_ref[...] * a0_ref[...] + b0_ref[...]           # outer ActNorm
    h1 = _first_conv(w1_ref[...], xn)                     # (F, T)
    sum_ref[...] += jnp.sum(h1, axis=1, keepdims=True)
    sumsq_ref[...] += jnp.sum(h1 * h1, axis=1, keepdims=True)


# ----------------------------------------------------------------------------
# Pass C: sum / sumsq of h2 = W2 @ relu(norm(h1))  (coupling ActNorm #2 stats)
# ----------------------------------------------------------------------------
def _h2_stats_kernel(x_ref, a0_ref, b0_ref, w1_ref, a1_ref, b1_ref, w2_ref,
                     sum_ref, sumsq_ref):
    @pl.when(_is_first_step())
    def _init():
        sum_ref[...] = jnp.zeros_like(sum_ref)
        sumsq_ref[...] = jnp.zeros_like(sumsq_ref)

    xn = x_ref[...] * a0_ref[...] + b0_ref[...]
    h1 = jnp.maximum(_first_conv(w1_ref[...], xn) * a1_ref[...] + b1_ref[...],
                     0.0)
    h2 = jnp.dot(w2_ref[...], h1, preferred_element_type=jnp.float32)  # (F, T)
    sum_ref[...] += jnp.sum(h2, axis=1, keepdims=True)
    sumsq_ref[...] += jnp.sum(h2 * h2, axis=1, keepdims=True)


# ----------------------------------------------------------------------------
# Pass D: apply pass -- writes the full (C, T) output tile (pass-through half
# included, so there is no wrapper-side concat / extra HBM round trip).
# ----------------------------------------------------------------------------
def _apply_kernel(x_ref, a0_ref, b0_ref, w1_ref, a1_ref, b1_ref, w2_ref,
                  a2_ref, b2_ref, wz_ref, bz_ref, szexp_ref, out_ref):
    c = x_ref.shape[0]
    c1 = wz_ref.shape[0]

    xn = x_ref[...] * a0_ref[...] + b0_ref[...]           # outer ActNorm (DDI)
    h1 = jnp.maximum(_first_conv(w1_ref[...], xn) * a1_ref[...] + b1_ref[...],
                     0.0)
    h2 = jnp.maximum(
        jnp.dot(w2_ref[...], h1, preferred_element_type=jnp.float32)
        * a2_ref[...] + b2_ref[...], 0.0)                 # (F, T)

    wz = wz_ref[...]                                      # (C1, F, 1)
    for j in range(c):
        src = c - 1 - j                                   # InvConv2d reversal
        row = xn[src:src + 1, :]                          # (1, T)
        if j >= c1:
            k = j - c1
            # ZeroConv2d row: M = C1 is tiny -> sublane reduction, not MXU.
            sh = jnp.sum(wz[k] * h2, axis=0, keepdims=True)        # (1, T)
            row = row + (sh + bz_ref[k:k + 1, :]) * szexp_ref[k:k + 1, :]
        out_ref[j:j + 1, :] = row


# ----------------------------------------------------------------------------
# Wrapper
# ----------------------------------------------------------------------------
def _pick_hw_tile(hw):
    # Largest lane-dense tile (multiple of 128) dividing H*W.  Cap at 2048 so
    # double-buffered blocks stay well inside scoped VMEM on v5e/v6e/v7x
    # (raise towards 8192 on v7x/v6e for very large spatial extents).
    for t in (2048, 1024, 512, 256, 128):
        if hw % t == 0:
            return t
    return hw


def _affine_from_moments(s, sq, count, eps):
    """DDI ActNorm as an affine map:  a = 1/(std+eps),  b = -mean*a."""
    mu = s / count
    var = jnp.maximum(sq / count - mu * mu, 0.0)
    scale = 1.0 / (jnp.sqrt(var) + eps)
    return scale, -mu * scale


def flow_forward(x, params, *, eps=1e-6):
    """x: (N, C, H, W) float32 (NCHW, like the PyTorch module)."""
    n, c, hgt, wdt = x.shape
    c1 = c // 2
    hw = hgt * wdt
    count = float(n * hw)
    f = params["w1"].shape[0]

    x3 = x.reshape(n, c, hw)            # contiguous reshape; lane dim = H*W
    t = _pick_hw_tile(hw)
    grid = (n, hw // t)

    # Fold the InvConv2d channel reversal + chunk into the first conv weight:
    #   h1 = W1 @ y[:c1],  y[j] = xn[C-1-j]   =>   h1 = sum_ch W1p[:, ch]*xn[ch]
    w1p = jnp.zeros((f, c), jnp.float32).at[:, c1:].set(params["w1"][:, ::-1])
    w1cols = jnp.transpose(w1p, (1, 0))[:, :, None]        # (C,  F, 1)
    wzcols = params["wz"][:, :, None]                      # (C1, F, 1)
    bz = params["bz"].reshape(c1, 1)
    szexp = jnp.exp(3.0 * params["sz"]).reshape(c1, 1)     # ZeroConv2d scale
    w2 = params["w2"]

    x_spec = pl.BlockSpec((None, c, t), lambda i, j: (i, 0, j))

    def const_spec(shape):
        nd = len(shape)
        return pl.BlockSpec(shape, lambda i, j: (0,) * nd)

    acc_cp = pltpu.CompilerParams(
        dimension_semantics=("arbitrary", "arbitrary"),
        vmem_limit_bytes=_VMEM_LIMIT)
    par_cp = pltpu.CompilerParams(
        dimension_semantics=("parallel", "parallel"),
        vmem_limit_bytes=_VMEM_LIMIT)

    # ---- Pass A: outer ActNorm DDI statistics ------------------------------
    sum_x, sumsq_x = pl.pallas_call(
        _channel_stats_kernel,
        grid=grid,
        in_specs=[x_spec],
        out_specs=[const_spec((c, 1)), const_spec((c, 1))],
        out_shape=[jax.ShapeDtypeStruct((c, 1), jnp.float32)] * 2,
        compiler_params=acc_cp,
    )(x3)
    a0, b0 = _affine_from_moments(sum_x, sumsq_x, count, eps)
    logdet = (hw * jnp.sum(jnp.log(a0))).astype(jnp.float32)

    # ---- Pass B: coupling ActNorm #1 statistics ----------------------------
    sum_h1, sumsq_h1 = pl.pallas_call(
        _h1_stats_kernel,
        grid=grid,
        in_specs=[x_spec, const_spec((c, 1)), const_spec((c, 1)),
                  const_spec((c, f, 1))],
        out_specs=[const_spec((f, 1)), const_spec((f, 1))],
        out_shape=[jax.ShapeDtypeStruct((f, 1), jnp.float32)] * 2,
        compiler_params=acc_cp,
    )(x3, a0, b0, w1cols)
    a1, b1 = _affine_from_moments(sum_h1, sumsq_h1, count, eps)

    # ---- Pass C: coupling ActNorm #2 statistics ----------------------------
    sum_h2, sumsq_h2 = pl.pallas_call(
        _h2_stats_kernel,
        grid=grid,
        in_specs=[x_spec, const_spec((c, 1)), const_spec((c, 1)),
                  const_spec((c, f, 1)), const_spec((f, 1)),
                  const_spec((f, 1)), const_spec((f, f))],
        out_specs=[const_spec((f, 1)), const_spec((f, 1))],
        out_shape=[jax.ShapeDtypeStruct((f, 1), jnp.float32)] * 2,
        compiler_params=acc_cp,
    )(x3, a0, b0, w1cols, a1, b1, w2)
    a2, b2 = _affine_from_moments(sum_h2, sumsq_h2, count, eps)

    # ---- Pass D: apply (full output written, parallel over both grid axes) -
    flops = int(2 * n * hw * (c * f + f * f + f * c1))
    bytes_accessed = int(4 * (2 * n * c * hw))
    cost = pl.CostEstimate(flops=flops, transcendentals=0,
                           bytes_accessed=bytes_accessed)

    out3 = pl.pallas_call(
        _apply_kernel,
        grid=grid,
        in_specs=[x_spec, const_spec((c, 1)), const_spec((c, 1)),
                  const_spec((c, f, 1)), const_spec((f, 1)),
                  const_spec((f, 1)), const_spec((f, f)),
                  const_spec((f, 1)), const_spec((f, 1)),
                  const_spec((c1, f, 1)), const_spec((c1, 1)),
                  const_spec((c1, 1))],
        out_specs=x_spec,
        out_shape=jax.ShapeDtypeStruct((n, c, hw), jnp.float32),
        compiler_params=par_cp,
        cost_estimate=cost,
    )(x3, a0, b0, w1cols, a1, b1, w2, a2, b2, wzcols, bz, szexp)

    return out3.reshape(n, c, hgt, wdt), logdet


# ----------------------------------------------------------------------------
# Parameters (deterministic stand-in for torch's normal_(0, 0.05) init;
# ZeroConv2d weight/bias/scale are zero-initialized exactly as in __init__).
# ----------------------------------------------------------------------------
def make_params(in_channel, filter_size=32, seed=0):
    c1 = in_channel // 2
    k1, k2 = jax.random.split(jax.random.PRNGKey(seed))
    return dict(
        w1=0.05 * jax.random.normal(k1, (filter_size, c1), jnp.float32),
        w2=0.05 * jax.random.normal(k2, (filter_size, filter_size),
                                    jnp.float32),
        wz=jnp.zeros((c1, filter_size), jnp.float32),
        bz=jnp.zeros((c1,), jnp.float32),
        sz=jnp.zeros((c1,), jnp.float32),
    )


# ----------------------------------------------------------------------------
# Pure-JAX reference mirroring the PyTorch Flow.forward (first call, DDI path).
# ----------------------------------------------------------------------------
def flow_reference(x, params, eps=1e-6):
    n, c, hgt, wdt = x.shape
    c1 = c // 2

    def ddi_stats(h):
        fl = jnp.transpose(h, (1, 0, 2, 3)).reshape(h.shape[1], -1)
        m = fl.mean(axis=1)
        s = jnp.sqrt(((fl - m[:, None]) ** 2).mean(axis=1))
        return m, s

    def conv1x1(h, w):
        return jnp.einsum('oi,nihw->nohw', w, h,
                          precision=jax.lax.Precision.HIGHEST)

    # ActNorm (DDI, logdet=True)
    mean, std = ddi_stats(x)
    logs = jnp.log(1.0 / (std + eps))
    logdet = hgt * wdt * jnp.sum(logs)
    y = jnp.exp(logs)[None, :, None, None] * (x - mean[None, :, None, None])
    # InvConv2d: channel reversal
    y = y[:, ::-1]
    # AdditiveCoupling
    x1, x2 = y[:, :c1], y[:, c1:]
    h = conv1x1(x1, params["w1"])
    m, s = ddi_stats(h)
    h = jax.nn.relu((h - m[None, :, None, None]) / (s + eps)[None, :, None, None])
    h = conv1x1(h, params["w2"])
    m, s = ddi_stats(h)
    h = jax.nn.relu((h - m[None, :, None, None]) / (s + eps)[None, :, None, None])
    shift = conv1x1(h, params["wz"]) + params["bz"][None, :, None, None]
    shift = shift * jnp.exp(3.0 * params["sz"])[None, :, None, None]
    out = jnp.concatenate([x1, x2 + shift], axis=1)
    return out, logdet


if __name__ == "__main__":
    N, C, H, W = 2, 4, 16, 16
    x = jax.random.normal(jax.random.PRNGKey(0), (N, C, H, W), jnp.float32)

    flow = jax.jit(flow_forward)

    # --- Faithful first-forward of Flow (ZeroConv2d zero-initialized) -------
    params = make_params(C, filter_size=32, seed=0)
    out, obj = flow(x, params)
    out = jax.block_until_ready(out)
    ref_out, ref_obj = flow_reference(x, params)
    assert out.shape == x.shape and out.dtype == x.dtype
    assert bool(jnp.allclose(out, ref_out, atol=1e-4, rtol=1e-4))
    assert bool(jnp.allclose(obj, ref_obj, atol=1e-2, rtol=1e-4))

    # --- Exercise the full coupling compute path (non-zero ZeroConv2d) ------
    ks = jax.random.split(jax.random.PRNGKey(1), 3)
    params2 = dict(params)
    params2["wz"] = 0.05 * jax.random.normal(ks[0], params["wz"].shape)
    params2["bz"] = 0.05 * jax.random.normal(ks[1], params["bz"].shape)
    params2["sz"] = 0.05 * jax.random.normal(ks[2], params["sz"].shape)
    out2, obj2 = flow(x, params2)
    out2 = jax.block_until_ready(out2)
    ref2, ref_obj2 = flow_reference(x, params2)
    assert bool(jnp.allclose(out2, ref2, atol=2e-4, rtol=2e-4))
    assert bool(jnp.allclose(obj2, ref_obj2, atol=1e-2, rtol=1e-4))

    print("KERNEL_OK")
</pallas_src>

<mosaic_0001>
module attributes {stable_mosaic.version = 11 : i64} {
  func.func @_channel_stats_kernel(%arg0: i32, %arg1: i32, %arg2: memref<1x4x256xf32, #tpu.memory_space<vmem>>, %arg3: memref<4x1xf32, #tpu.memory_space<vmem>>, %arg4: memref<4x1xf32, #tpu.memory_space<vmem>>) attributes {dimension_semantics = [#tpu.dimension_semantics<arbitrary>, #tpu.dimension_semantics<arbitrary>], iteration_bounds = array<i64: 2, 1>, scalar_prefetch = 0 : i64, scratch_operands = 0 : i64, tpu.core_type = #tpu.core_type<tc>, window_params = [{transform_indices = @transform_0, window_bounds = array<i64: 1, 4, 256>}, {pipeline_mode = #tpu.pipeline_mode<synchronous>, transform_indices = @transform_1, window_bounds = array<i64: 4, 1>}, {pipeline_mode = #tpu.pipeline_mode<synchronous>, transform_indices = @transform_2, window_bounds = array<i64: 4, 1>}]} {
    %c0_i32 = arith.constant 0 : i32
    %0 = arith.cmpi eq, %arg0, %c0_i32 : i32
    %c0_i32_0 = arith.constant 0 : i32
    %1 = arith.cmpi eq, %arg1, %c0_i32_0 : i32
    %2 = arith.andi %0, %1 : i1
    %3 = arith.extui %2 : i1 to i32
    %c0_i32_1 = arith.constant 0 : i32
    %4 = arith.cmpi ne, %3, %c0_i32_1 : i32
    scf.if %4 {
      %cst_13 = arith.constant 0.000000e+00 : f32
      %18 = vector.broadcast %cst_13 : f32 to vector<4x1xf32>
      %c0_14 = arith.constant 0 : index
      %c0_15 = arith.constant 0 : index
      %19 = vector.load %arg3[%c0_14, %c0_15] : memref<4x1xf32, #tpu.memory_space<vmem>>, vector<4x1xf32>
      tpu.vector_store %arg3[%c0_14, %c0_15], %18 {strides = array<i32>} : memref<4x1xf32, #tpu.memory_space<vmem>>, vector<4x1xf32>,
      %cst_16 = arith.constant 0.000000e+00 : f32
      %20 = vector.broadcast %cst_16 : f32 to vector<4x1xf32>
      %c0_17 = arith.constant 0 : index
      %c0_18 = arith.constant 0 : index
      %21 = vector.load %arg4[%c0_17, %c0_18] : memref<4x1xf32, #tpu.memory_space<vmem>>, vector<4x1xf32>
      tpu.vector_store %arg4[%c0_17, %c0_18], %20 {strides = array<i32>} : memref<4x1xf32, #tpu.memory_space<vmem>>, vector<4x1xf32>,
    } else {
    }
    %c0 = arith.constant 0 : index
    %c0_2 = arith.constant 0 : index
    %c0_3 = arith.constant 0 : index
    %5 = vector.load %arg2[%c0, %c0_2, %c0_3] : memref<1x4x256xf32, #tpu.memory_space<vmem>>, vector<1x4x256xf32>
    %6 = vector.shape_cast %5 : vector<1x4x256xf32> to vector<4x256xf32>
    %c0_4 = arith.constant 0 : index
    %c0_5 = arith.constant 0 : index
    %7 = vector.load %arg3[%c0_4, %c0_5] : memref<4x1xf32, #tpu.memory_space<vmem>>, vector<4x1xf32>
    %cst = arith.constant dense<0.000000e+00> : vector<4xf32>
    %8 = vector.multi_reduction <add>, %6, %cst [1] : vector<4x256xf32> to vector<4xf32>
    %9 = vector.shape_cast %8 : vector<4xf32> to vector<4x1xf32>
    %10 = arith.addf %7, %9 : vector<4x1xf32>
    %c0_6 = arith.constant 0 : index
    %c0_7 = arith.constant 0 : index
    %11 = vector.load %arg3[%c0_6, %c0_7] : memref<4x1xf32, #tpu.memory_space<vmem>>, vector<4x1xf32>
    tpu.vector_store %arg3[%c0_6, %c0_7], %10 {strides = array<i32>} : memref<4x1xf32, #tpu.memory_space<vmem>>, vector<4x1xf32>,
    %c0_8 = arith.constant 0 : index
    %c0_9 = arith.constant 0 : index
    %12 = vector.load %arg4[%c0_8, %c0_9] : memref<4x1xf32, #tpu.memory_space<vmem>>, vector<4x1xf32>
    %13 = arith.mulf %6, %6 : vector<4x256xf32>
    %cst_10 = arith.constant dense<0.000000e+00> : vector<4xf32>
    %14 = vector.multi_reduction <add>, %13, %cst_10 [1] : vector<4x256xf32> to vector<4xf32>
    %15 = vector.shape_cast %14 : vector<4xf32> to vector<4x1xf32>
    %16 = arith.addf %12, %15 : vector<4x1xf32>
    %c0_11 = arith.constant 0 : index
    %c0_12 = arith.constant 0 : index
    %17 = vector.load %arg4[%c0_11, %c0_12] : memref<4x1xf32, #tpu.memory_space<vmem>>, vector<4x1xf32>
    tpu.vector_store %arg4[%c0_11, %c0_12], %16 {strides = array<i32>} : memref<4x1xf32, #tpu.memory_space<vmem>>, vector<4x1xf32>,
    return
  }
  func.func @transform_0(%arg0: i32, %arg1: i32) -> (i32, i32, i32) {
    %c0_i32 = arith.constant 0 : i32
    %c0_i32_0 = arith.constant 0 : i32
    return %arg0, %c0_i32, %arg1 : i32, i32, i32
  }
  func.func @transform_1(%arg0: i32, %arg1: i32) -> (i32, i32) {
    %c0_i32 = arith.constant 0 : i32
    %c0_i32_0 = arith.constant 0 : i32
    %c0_i32_1 = arith.constant 0 : i32
    return %c0_i32, %c0_i32_0 : i32, i32
  }
  func.func @transform_2(%arg0: i32, %arg1: i32) -> (i32, i32) {
    %c0_i32 = arith.constant 0 : i32
    %c0_i32_0 = arith.constant 0 : i32
    %c0_i32_1 = arith.constant 0 : i32
    return %c0_i32, %c0_i32_0 : i32, i32
  }
}

module attributes {stable_mosaic.version = 11 : i64} {
  func.func @_h1_stats_kernel(%arg0: i32, %arg1: i32, %arg2: memref<1x4x256xf32, #tpu.memory_space<vmem>>, %arg3: memref<4x1xf32, #tpu.memory_space<vmem>>, %arg4: memref<4x1xf32, #tpu.memory_space<vmem>>, %arg5: memref<4x32x1xf32, #tpu.memory_space<vmem>>, %arg6: memref<32x1xf32, #tpu.memory_space<vmem>>, %arg7: memref<32x1xf32, #tpu.memory_space<vmem>>) attributes {dimension_semantics = [#tpu.dimension_semantics<arbitrary>, #tpu.dimension_semantics<arbitrary>], iteration_bounds = array<i64: 2, 1>, scalar_prefetch = 0 : i64, scratch_operands = 0 : i64, tpu.core_type = #tpu.core_type<tc>, window_params = [{transform_indices = @transform_0, window_bounds = array<i64: 1, 4, 256>}, {pipeline_mode = #tpu.pipeline_mode<synchronous>, transform_indices = @transform_1, window_bounds = array<i64: 4, 1>}, {pipeline_mode = #tpu.pipeline_mode<synchronous>, transform_indices = @transform_2, window_bounds = array<i64: 4, 1>}, {pipeline_mode = #tpu.pipeline_mode<synchronous>, transform_indices = @transform_3, window_bounds = array<i64: 4, 32, 1>}, {pipeline_mode = #tpu.pipeline_mode<synchronous>, transform_indices = @transform_4, window_bounds = array<i64: 32, 1>}, {pipeline_mode = #tpu.pipeline_mode<synchronous>, transform_indices = @transform_5, window_bounds = array<i64: 32, 1>}]} {
    %c0_i32 = arith.constant 0 : i32
    %0 = arith.cmpi eq, %arg0, %c0_i32 : i32
    %c0_i32_0 = arith.constant 0 : i32
    %1 = arith.cmpi eq, %arg1, %c0_i32_0 : i32
    %2 = arith.andi %0, %1 : i1
    %3 = arith.extui %2 : i1 to i32
    %c0_i32_1 = arith.constant 0 : i32
    %4 = arith.cmpi ne, %3, %c0_i32_1 : i32
    scf.if %4 {
      %cst_20 = arith.constant 0.000000e+00 : f32
      %52 = vector.broadcast %cst_20 : f32 to vector<32x1xf32>
      %c0_21 = arith.constant 0 : index
      %c0_22 = arith.constant 0 : index
      %53 = vector.load %arg6[%c0_21, %c0_22] : memref<32x1xf32, #tpu.memory_space<vmem>>, vector<32x1xf32>
      tpu.vector_store %arg6[%c0_21, %c0_22], %52 {strides = array<i32>} : memref<32x1xf32, #tpu.memory_space<vmem>>, vector<32x1xf32>,
      %cst_23 = arith.constant 0.000000e+00 : f32
      %54 = vector.broadcast %cst_23 : f32 to vector<32x1xf32>
      %c0_24 = arith.constant 0 : index
      %c0_25 = arith.constant 0 : index
      %55 = vector.load %arg7[%c0_24, %c0_25] : memref<32x1xf32, #tpu.memory_space<vmem>>, vector<32x1xf32>
      tpu.vector_store %arg7[%c0_24, %c0_25], %54 {strides = array<i32>} : memref<32x1xf32, #tpu.memory_space<vmem>>, vector<32x1xf32>,
    } else {
    }
    %c0 = arith.constant 0 : index
    %c0_2 = arith.constant 0 : index
    %c0_3 = arith.constant 0 : index
    %5 = vector.load %arg2[%c0, %c0_2, %c0_3] : memref<1x4x256xf32, #tpu.memory_space<vmem>>, vector<1x4x256xf32>
    %6 = vector.shape_cast %5 : vector<1x4x256xf32> to vector<4x256xf32>
    %c0_4 = arith.constant 0 : index
    %c0_5 = arith.constant 0 : index
    %7 = vector.load %arg3[%c0_4, %c0_5] : memref<4x1xf32, #tpu.memory_space<vmem>>, vector<4x1xf32>
    %8 = vector.broadcast %7 : vector<4x1xf32> to vector<4x256xf32>
    %9 = arith.mulf %6, %8 : vector<4x256xf32>
    %c0_6 = arith.constant 0 : index
    %c0_7 = arith.constant 0 : index
    %10 = vector.load %arg4[%c0_6, %c0_7] : memref<4x1xf32, #tpu.memory_space<vmem>>, vector<4x1xf32>
    %11 = vector.broadcast %10 : vector<4x1xf32> to vector<4x256xf32>
    %12 = arith.addf %9, %11 : vector<4x256xf32>
    %c0_8 = arith.constant 0 : index
    %c0_9 = arith.constant 0 : index
    %c0_10 = arith.constant 0 : index
    %13 = vector.load %arg5[%c0_8, %c0_9, %c0_10] : memref<4x32x1xf32, #tpu.memory_space<vmem>>, vector<4x32x1xf32>
    %14 = vector.extract_strided_slice %13 {offsets = [0, 0, 0], sizes = [1, 32, 1], strides = [1, 1, 1]} : vector<4x32x1xf32> to vector<1x32x1xf32>
    %15 = vector.shape_cast %14 : vector<1x32x1xf32> to vector<32x1xf32>
    %16 = vector.extract_strided_slice %12 {offsets = [0, 0], sizes = [1, 256], strides = [1, 1]} : vector<4x256xf32> to vector<1x256xf32>
    %17 = vector.broadcast %15 : vector<32x1xf32> to vector<32x256xf32>
    %18 = vector.broadcast %16 : vector<1x256xf32> to vector<32x256xf32>
    %19 = arith.mulf %17, %18 : vector<32x256xf32>
    %20 = vector.extract_strided_slice %13 {offsets = [1, 0, 0], sizes = [1, 32, 1], strides = [1, 1, 1]} : vector<4x32x1xf32> to vector<1x32x1xf32>
    %21 = vector.shape_cast %20 : vector<1x32x1xf32> to vector<32x1xf32>
    %22 = vector.extract_strided_slice %12 {offsets = [1, 0], sizes = [1, 256], strides = [1, 1]} : vector<4x256xf32> to vector<1x256xf32>
    %23 = vector.broadcast %21 : vector<32x1xf32> to vector<32x256xf32>
    %24 = vector.broadcast %22 : vector<1x256xf32> to vector<32x256xf32>
    %25 = arith.mulf %23, %24 : vector<32x256xf32>
    %26 = arith.addf %19, %25 : vector<32x256xf32>
    %27 = vector.extract_strided_slice %13 {offsets = [2, 0, 0], sizes = [1, 32, 1], strides = [1, 1, 1]} : vector<4x32x1xf32> to vector<1x32x1xf32>
    %28 = vector.shape_cast %27 : vector<1x32x1xf32> to vector<32x1xf32>
    %29 = vector.extract_strided_slice %12 {offsets = [2, 0], sizes = [1, 256], strides = [1, 1]} : vector<4x256xf32> to vector<1x256xf32>
    %30 = vector.broadcast %28 : vector<32x1xf32> to vector<32x256xf32>
    %31 = vector.broadcast %29 : vector<1x256xf32> to vector<32x256xf32>
    %32 = arith.mulf %30, %31 : vector<32x256xf32>
    %33 = arith.addf %26, %32 : vector<32x256xf32>
    %34 = vector.extract_strided_slice %13 {offsets = [3, 0, 0], sizes = [1, 32, 1], strides = [1, 1, 1]} : vector<4x32x1xf32> to vector<1x32x1xf32>
    %35 = vector.shape_cast %34 : vector<1x32x1xf32> to vector<32x1xf32>
    %36 = vector.extract_strided_slice %12 {offsets = [3, 0], sizes = [1, 256], strides = [1, 1]} : vector<4x256xf32> to vector<1x256xf32>
    %37 = vector.broadcast %35 : vector<32x1xf32> to vector<32x256xf32>
    %38 = vector.broadcast %36 : vector<1x256xf32> to vector<32x256xf32>
    %39 = arith.mulf %37, %38 : vector<32x256xf32>
    %40 = arith.addf %33, %39 : vector<32x256xf32>
    %c0_11 = arith.constant 0 : index
    %c0_12 = arith.constant 0 : index
    %41 = vector.load %arg6[%c0_11, %c0_12] : memref<32x1xf32, #tpu.memory_space<vmem>>, vector<32x1xf32>
    %cst = arith.constant dense<0.000000e+00> : vector<32xf32>
    %42 = vector.multi_reduction <add>, %40, %cst [1] : vector<32x256xf32> to vector<32xf32>
    %43 = vector.shape_cast %42 : vector<32xf32> to vector<32x1xf32>
    %44 = arith.addf %41, %43 : vector<32x1xf32>
    %c0_13 = arith.constant 0 : index
    %c0_14 = arith.constant 0 : index
    %45 = vector.load %arg6[%c0_13, %c0_14] : memref<32x1xf32, #tpu.memory_space<vmem>>, vector<32x1xf32>
    tpu.vector_store %arg6[%c0_13, %c0_14], %44 {strides = array<i32>} : memref<32x1xf32, #tpu.memory_space<vmem>>, vector<32x1xf32>,
    %c0_15 = arith.constant 0 : index
    %c0_16 = arith.constant 0 : index
    %46 = vector.load %arg7[%c0_15, %c0_16] : memref<32x1xf32, #tpu.memory_space<vmem>>, vector<32x1xf32>
    %47 = arith.mulf %40, %40 : vector<32x256xf32>
    %cst_17 = arith.constant dense<0.000000e+00> : vector<32xf32>
    %48 = vector.multi_reduction <add>, %47, %cst_17 [1] : vector<32x256xf32> to vector<32xf32>
    %49 = vector.shape_cast %48 : vector<32xf32> to vector<32x1xf32>
    %50 = arith.addf %46, %49 : vector<32x1xf32>
    %c0_18 = arith.constant 0 : index
    %c0_19 = arith.constant 0 : index
    %51 = vector.load %arg7[%c0_18, %c0_19] : memref<32x1xf32, #tpu.memory_space<vmem>>, vector<32x1xf32>
    tpu.vector_store %arg7[%c0_18, %c0_19], %50 {strides = array<i32>} : memref<32x1xf32, #tpu.memory_space<vmem>>, vector<32x1xf32>,
    return
  }
  func.func @transform_0(%arg0: i32, %arg1: i32) -> (i32, i32, i32) {
    %c0_i32 = arith.constant 0 : i32
    %c0_i32_0 = arith.constant 0 : i32
    return %arg0, %c0_i32, %arg1 : i32, i32, i32
  }
  func.func @transform_1(%arg0: i32, %arg1: i32) -> (i32, i32) {
    %c0_i32 = arith.constant 0 : i32
    %c0_i32_0 = arith.constant 0 : i32
    %c0_i32_1 = arith.constant 0 : i32
    return %c0_i32, %c0_i32_0 : i32, i32
  }
  func.func @transform_2(%arg0: i32, %arg1: i32) -> (i32, i32) {
    %c0_i32 = arith.constant 0 : i32
    %c0_i32_0 = arith.constant 0 : i32
    %c0_i32_1 = arith.constant 0 : i32
    return %c0_i32, %c0_i32_0 : i32, i32
  }
  func.func @transform_3(%arg0: i32, %arg1: i32) -> (i32, i32, i32) {
    %c0_i32 = arith.constant 0 : i32
    %c0_i32_0 = arith.constant 0 : i32
    %c0_i32_1 = arith.constant 0 : i32
    %c0_i32_2 = arith.constant 0 : i32
    return %c0_i32, %c0_i32_0, %c0_i32_1 : i32, i32, i32
  }
  func.func @transform_4(%arg0: i32, %arg1: i32) -> (i32, i32) {
    %c0_i32 = arith.constant 0 : i32
    %c0_i32_0 = arith.constant 0 : i32
    %c0_i32_1 = arith.constant 0 : i32
    return %c0_i32, %c0_i32_0 : i32, i32
  }
  func.func @transform_5(%arg0: i32, %arg1: i32) -> (i32, i32) {
    %c0_i32 = arith.constant 0 : i32
    %c0_i32_0 = arith.constant 0 : i32
    %c0_i32_1 = arith.constant 0 : i32
    return %c0_i32, %c0_i32_0 : i32, i32
  }
}

module attributes {stable_mosaic.version = 11 : i64} {
  func.func @_h2_stats_kernel(%arg0: i32, %arg1: i32, %arg2: memref<1x4x256xf32, #tpu.memory_space<vmem>>, %arg3: memref<4x1xf32, #tpu.memory_space<vmem>>, %arg4: memref<4x1xf32, #tpu.memory_space<vmem>>, %arg5: memref<4x32x1xf32, #tpu.memory_space<vmem>>, %arg6: memref<32x1xf32, #tpu.memory_space<vmem>>, %arg7: memref<32x1xf32, #tpu.memory_space<vmem>>, %arg8: memref<32x32xf32, #tpu.memory_space<vmem>>, %arg9: memref<32x1xf32, #tpu.memory_space<vmem>>, %arg10: memref<32x1xf32, #tpu.memory_space<vmem>>) attributes {dimension_semantics = [#tpu.dimension_semantics<arbitrary>, #tpu.dimension_semantics<arbitrary>], iteration_bounds = array<i64: 2, 1>, scalar_prefetch = 0 : i64, scratch_operands = 0 : i64, tpu.core_type = #tpu.core_type<tc>, window_params = [{transform_indices = @transform_0, window_bounds = array<i64: 1, 4, 256>}, {pipeline_mode = #tpu.pipeline_mode<synchronous>, transform_indices = @transform_1, window_bounds = array<i64: 4, 1>}, {pipeline_mode = #tpu.pipeline_mode<synchronous>, transform_indices = @transform_2, window_bounds = array<i64: 4, 1>}, {pipeline_mode = #tpu.pipeline_mode<synchronous>, transform_indices = @transform_3, window_bounds = array<i64: 4, 32, 1>}, {pipeline_mode = #tpu.pipeline_mode<synchronous>, transform_indices = @transform_4, window_bounds = array<i64: 32, 1>}, {pipeline_mode = #tpu.pipeline_mode<synchronous>, transform_indices = @transform_5, window_bounds = array<i64: 32, 1>}, {pipeline_mode = #tpu.pipeline_mode<synchronous>, transform_indices = @transform_6, window_bounds = array<i64: 32, 32>}, {pipeline_mode = #tpu.pipeline_mode<synchronous>, transform_indices = @transform_7, window_bounds = array<i64: 32, 1>}, {pipeline_mode = #tpu.pipeline_mode<synchronous>, transform_indices = @transform_8, window_bounds = array<i64: 32, 1>}]} {
    %c0_i32 = arith.constant 0 : i32
    %0 = arith.cmpi eq, %arg0, %c0_i32 : i32
    %c0_i32_0 = arith.constant 0 : i32
    %1 = arith.cmpi eq, %arg1, %c0_i32_0 : i32
    %2 = arith.andi %0, %1 : i1
    %3 = arith.extui %2 : i1 to i32
    %c0_i32_1 = arith.constant 0 : i32
    %4 = arith.cmpi ne, %3, %c0_i32_1 : i32
    scf.if %4 {
      %cst_28 = arith.constant 0.000000e+00 : f32
      %62 = vector.broadcast %cst_28 : f32 to vector<32x1xf32>
      %c0_29 = arith.constant 0 : index
      %c0_30 = arith.constant 0 : index
      %63 = vector.load %arg9[%c0_29, %c0_30] : memref<32x1xf32, #tpu.memory_space<vmem>>, vector<32x1xf32>
      tpu.vector_store %arg9[%c0_29, %c0_30], %62 {strides = array<i32>} : memref<32x1xf32, #tpu.memory_space<vmem>>, vector<32x1xf32>,
      %cst_31 = arith.constant 0.000000e+00 : f32
      %64 = vector.broadcast %cst_31 : f32 to vector<32x1xf32>
      %c0_32 = arith.constant 0 : index
      %c0_33 = arith.constant 0 : index
      %65 = vector.load %arg10[%c0_32, %c0_33] : memref<32x1xf32, #tpu.memory_space<vmem>>, vector<32x1xf32>
      tpu.vector_store %arg10[%c0_32, %c0_33], %64 {strides = array<i32>} : memref<32x1xf32, #tpu.memory_space<vmem>>, vector<32x1xf32>,
    } else {
    }
    %c0 = arith.constant 0 : index
    %c0_2 = arith.constant 0 : index
    %c0_3 = arith.constant 0 : index
    %5 = vector.load %arg2[%c0, %c0_2, %c0_3] : memref<1x4x256xf32, #tpu.memory_space<vmem>>, vector<1x4x256xf32>
    %6 = vector.shape_cast %5 : vector<1x4x256xf32> to vector<4x256xf32>
    %c0_4 = arith.constant 0 : index
    %c0_5 = arith.constant 0 : index
    %7 = vector.load %arg3[%c0_4, %c0_5] : memref<4x1xf32, #tpu.memory_space<vmem>>, vector<4x1xf32>
    %8 = vector.broadcast %7 : vector<4x1xf32> to vector<4x256xf32>
    %9 = arith.mulf %6, %8 : vector<4x256xf32>
    %c0_6 = arith.constant 0 : index
    %c0_7 = arith.constant 0 : index
    %10 = vector.load %arg4[%c0_6, %c0_7] : memref<4x1xf32, #tpu.memory_space<vmem>>, vector<4x1xf32>
    %11 = vector.broadcast %10 : vector<4x1xf32> to vector<4x256xf32>
    %12 = arith.addf %9, %11 : vector<4x256xf32>
    %c0_8 = arith.constant 0 : index
    %c0_9 = arith.constant 0 : index
    %c0_10 = arith.constant 0 : index
    %13 = vector.load %arg5[%c0_8, %c0_9, %c0_10] : memref<4x32x1xf32, #tpu.memory_space<vmem>>, vector<4x32x1xf32>
    %14 = vector.extract_strided_slice %13 {offsets = [0, 0, 0], sizes = [1, 32, 1], strides = [1, 1, 1]} : vector<4x32x1xf32> to vector<1x32x1xf32>
    %15 = vector.shape_cast %14 : vector<1x32x1xf32> to vector<32x1xf32>
    %16 = vector.extract_strided_slice %12 {offsets = [0, 0], sizes = [1, 256], strides = [1, 1]} : vector<4x256xf32> to vector<1x256xf32>
    %17 = vector.broadcast %15 : vector<32x1xf32> to vector<32x256xf32>
    %18 = vector.broadcast %16 : vector<1x256xf32> to vector<32x256xf32>
    %19 = arith.mulf %17, %18 : vector<32x256xf32>
    %20 = vector.extract_strided_slice %13 {offsets = [1, 0, 0], sizes = [1, 32, 1], strides = [1, 1, 1]} : vector<4x32x1xf32> to vector<1x32x1xf32>
    %21 = vector.shape_cast %20 : vector<1x32x1xf32> to vector<32x1xf32>
    %22 = vector.extract_strided_slice %12 {offsets = [1, 0], sizes = [1, 256], strides = [1, 1]} : vector<4x256xf32> to vector<1x256xf32>
    %23 = vector.broadcast %21 : vector<32x1xf32> to vector<32x256xf32>
    %24 = vector.broadcast %22 : vector<1x256xf32> to vector<32x256xf32>
    %25 = arith.mulf %23, %24 : vector<32x256xf32>
    %26 = arith.addf %19, %25 : vector<32x256xf32>
    %27 = vector.extract_strided_slice %13 {offsets = [2, 0, 0], sizes = [1, 32, 1], strides = [1, 1, 1]} : vector<4x32x1xf32> to vector<1x32x1xf32>
    %28 = vector.shape_cast %27 : vector<1x32x1xf32> to vector<32x1xf32>
    %29 = vector.extract_strided_slice %12 {offsets = [2, 0], sizes = [1, 256], strides = [1, 1]} : vector<4x256xf32> to vector<1x256xf32>
    %30 = vector.broadcast %28 : vector<32x1xf32> to vector<32x256xf32>
    %31 = vector.broadcast %29 : vector<1x256xf32> to vector<32x256xf32>
    %32 = arith.mulf %30, %31 : vector<32x256xf32>
    %33 = arith.addf %26, %32 : vector<32x256xf32>
    %34 = vector.extract_strided_slice %13 {offsets = [3, 0, 0], sizes = [1, 32, 1], strides = [1, 1, 1]} : vector<4x32x1xf32> to vector<1x32x1xf32>
    %35 = vector.shape_cast %34 : vector<1x32x1xf32> to vector<32x1xf32>
    %36 = vector.extract_strided_slice %12 {offsets = [3, 0], sizes = [1, 256], strides = [1, 1]} : vector<4x256xf32> to vector<1x256xf32>
    %37 = vector.broadcast %35 : vector<32x1xf32> to vector<32x256xf32>
    %38 = vector.broadcast %36 : vector<1x256xf32> to vector<32x256xf32>
    %39 = arith.mulf %37, %38 : vector<32x256xf32>
    %40 = arith.addf %33, %39 : vector<32x256xf32>
    %c0_11 = arith.constant 0 : index
    %c0_12 = arith.constant 0 : index
    %41 = vector.load %arg6[%c0_11, %c0_12] : memref<32x1xf32, #tpu.memory_space<vmem>>, vector<32x1xf32>
    %42 = vector.broadcast %41 : vector<32x1xf32> to vector<32x256xf32>
    %43 = arith.mulf %40, %42 : vector<32x256xf32>
    %c0_13 = arith.constant 0 : index
    %c0_14 = arith.constant 0 : index
    %44 = vector.load %arg7[%c0_13, %c0_14] : memref<32x1xf32, #tpu.memory_space<vmem>>, vector<32x1xf32>
    %45 = vector.broadcast %44 : vector<32x1xf32> to vector<32x256xf32>
    %46 = arith.addf %43, %45 : vector<32x256xf32>
    %cst = arith.constant 0.000000e+00 : f32
    %47 = vector.broadcast %cst : f32 to vector<32x256xf32>
    %48 = arith.maximumf %46, %47 : vector<32x256xf32>
    %c0_15 = arith.constant 0 : index
    %c0_16 = arith.constant 0 : index
    %49 = vector.load %arg8[%c0_15, %c0_16] : memref<32x32xf32, #tpu.memory_space<vmem>>, vector<32x32xf32>
    %cst_17 = arith.constant dense<0.000000e+00> : vector<32x256xf32>
    %50 = tpu.matmul %49, %48, %cst_17 {dimension_numbers = #tpu.dot_dimension_numbers<[1], [0], [0], [1], [0, 0, 1, 1], [], []>} : vector<32x32xf32>, vector<32x256xf32>, vector<32x256xf32> -> vector<32x256xf32>
    %c0_18 = arith.constant 0 : index
    %c0_19 = arith.constant 0 : index
    %51 = vector.load %arg9[%c0_18, %c0_19] : memref<32x1xf32, #tpu.memory_space<vmem>>, vector<32x1xf32>
    %cst_20 = arith.constant dense<0.000000e+00> : vector<32xf32>
    %52 = vector.multi_reduction <add>, %50, %cst_20 [1] : vector<32x256xf32> to vector<32xf32>
    %53 = vector.shape_cast %52 : vector<32xf32> to vector<32x1xf32>
    %54 = arith.addf %51, %53 : vector<32x1xf32>
    %c0_21 = arith.constant 0 : index
    %c0_22 = arith.constant 0 : index
    %55 = vector.load %arg9[%c0_21, %c0_22] : memref<32x1xf32, #tpu.memory_space<vmem>>, vector<32x1xf32>
    tpu.vector_store %arg9[%c0_21, %c0_22], %54 {strides = array<i32>} : memref<32x1xf32, #tpu.memory_space<vmem>>, vector<32x1xf32>,
    %c0_23 = arith.constant 0 : index
    %c0_24 = arith.constant 0 : index
    %56 = vector.load %arg10[%c0_23, %c0_24] : memref<32x1xf32, #tpu.memory_space<vmem>>, vector<32x1xf32>
    %57 = arith.mulf %50, %50 : vector<32x256xf32>
    %cst_25 = arith.constant dense<0.000000e+00> : vector<32xf32>
    %58 = vector.multi_reduction <add>, %57, %cst_25 [1] : vector<32x256xf32> to vector<32xf32>
    %59 = vector.shape_cast %58 : vector<32xf32> to vector<32x1xf32>
    %60 = arith.addf %56, %59 : vector<32x1xf32>
    %c0_26 = arith.constant 0 : index
    %c0_27 = arith.constant 0 : index
    %61 = vector.load %arg10[%c0_26, %c0_27] : memref<32x1xf32, #tpu.memory_space<vmem>>, vector<32x1xf32>
    tpu.vector_store %arg10[%c0_26, %c0_27], %60 {strides = array<i32>} : memref<32x1xf32, #tpu.memory_space<vmem>>, vector<32x1xf32>,
    return
  }
  func.func @transform_0(%arg0: i32, %arg1: i32) -> (i32, i32, i32) {
    %c0_i32 = arith.constant 0 : i32
    %c0_i32_0 = arith.constant 0 : i32
    return %arg0, %c0_i32, %arg1 : i32, i32, i32
  }
  func.func @transform_1(%arg0: i32, %arg1: i32) -> (i32, i32) {
    %c0_i32 = arith.constant 0 : i32
    %c0_i32_0 = arith.constant 0 : i32
    %c0_i32_1 = arith.constant 0 : i32
    return %c0_i32, %c0_i32_0 : i32, i32
  }
  func.func @transform_2(%arg0: i32, %arg1: i32) -> (i32, i32) {
    %c0_i32 = arith.constant 0 : i32
    %c0_i32_0 = arith.constant 0 : i32
    %c0_i32_1 = arith.constant 0 : i32
    return %c0_i32, %c0_i32_0 : i32, i32
  }
  func.func @transform_3(%arg0: i32, %arg1: i32) -> (i32, i32, i32) {
    %c0_i32 = arith.constant 0 : i32
    %c0_i32_0 = arith.constant 0 : i32
    %c0_i32_1 = arith.constant 0 : i32
    %c0_i32_2 = arith.constant 0 : i32
    return %c0_i32, %c0_i32_0, %c0_i32_1 : i32, i32, i32
  }
  func.func @transform_4(%arg0: i32, %arg1: i32) -> (i32, i32) {
    %c0_i32 = arith.constant 0 : i32
    %c0_i32_0 = arith.constant 0 : i32
    %c0_i32_1 = arith.constant 0 : i32
    return %c0_i32, %c0_i32_0 : i32, i32
  }
  func.func @transform_5(%arg0: i32, %arg1: i32) -> (i32, i32) {
    %c0_i32 = arith.constant 0 : i32
    %c0_i32_0 = arith.constant 0 : i32
    %c0_i32_1 = arith.constant 0 : i32
    return %c0_i32, %c0_i32_0 : i32, i32
  }
  func.func @transform_6(%arg0: i32, %arg1: i32) -> (i32, i32) {
    %c0_i32 = arith.constant 0 : i32
    %c0_i32_0 = arith.constant 0 : i32
    %c0_i32_1 = arith.constant 0 : i32
    return %c0_i32, %c0_i32_0 : i32, i32
  }
  func.func @transform_7(%arg0: i32, %arg1: i32) -> (i32, i32) {
    %c0_i32 = arith.constant 0 : i32
    %c0_i32_0 = arith.constant 0 : i32
    %c0_i32_1 = arith.constant 0 : i32
    return %c0_i32, %c0_i32_0 : i32, i32
  }
  func.func @transform_8(%arg0: i32, %arg1: i32) -> (i32, i32) {
    %c0_i32 = arith.constant 0 : i32
    %c0_i32_0 = arith.constant 0 : i32
    %c0_i32_1 = arith.constant 0 : i32
    return %c0_i32, %c0_i32_0 : i32, i32
  }
}

module attributes {stable_mosaic.version = 11 : i64} {
  func.func @_apply_kernel(%arg0: i32, %arg1: i32, %arg2: memref<1x4x256xf32, #tpu.memory_space<vmem>>, %arg3: memref<4x1xf32, #tpu.memory_space<vmem>>, %arg4: memref<4x1xf32, #tpu.memory_space<vmem>>, %arg5: memref<4x32x1xf32, #tpu.memory_space<vmem>>, %arg6: memref<32x1xf32, #tpu.memory_space<vmem>>, %arg7: memref<32x1xf32, #tpu.memory_space<vmem>>, %arg8: memref<32x32xf32, #tpu.memory_space<vmem>>, %arg9: memref<32x1xf32, #tpu.memory_space<vmem>>, %arg10: memref<32x1xf32, #tpu.memory_space<vmem>>, %arg11: memref<2x32x1xf32, #tpu.memory_space<vmem>>, %arg12: memref<2x1xf32, #tpu.memory_space<vmem>>, %arg13: memref<2x1xf32, #tpu.memory_space<vmem>>, %arg14: memref<1x4x256xf32, #tpu.memory_space<vmem>>) attributes {dimension_semantics = [#tpu.dimension_semantics<parallel>, #tpu.dimension_semantics<parallel>], iteration_bounds = array<i64: 2, 1>, scalar_prefetch = 0 : i64, scratch_operands = 0 : i64, tpu.core_type = #tpu.core_type<tc>, window_params = [{transform_indices = @transform_0, window_bounds = array<i64: 1, 4, 256>}, {pipeline_mode = #tpu.pipeline_mode<synchronous>, transform_indices = @transform_1, window_bounds = array<i64: 4, 1>}, {pipeline_mode = #tpu.pipeline_mode<synchronous>, transform_indices = @transform_2, window_bounds = array<i64: 4, 1>}, {pipeline_mode = #tpu.pipeline_mode<synchronous>, transform_indices = @transform_3, window_bounds = array<i64: 4, 32, 1>}, {pipeline_mode = #tpu.pipeline_mode<synchronous>, transform_indices = @transform_4, window_bounds = array<i64: 32, 1>}, {pipeline_mode = #tpu.pipeline_mode<synchronous>, transform_indices = @transform_5, window_bounds = array<i64: 32, 1>}, {pipeline_mode = #tpu.pipeline_mode<synchronous>, transform_indices = @transform_6, window_bounds = array<i64: 32, 32>}, {pipeline_mode = #tpu.pipeline_mode<synchronous>, transform_indices = @transform_7, window_bounds = array<i64: 32, 1>}, {pipeline_mode = #tpu.pipeline_mode<synchronous>, transform_indices = @transform_8, window_bounds = array<i64: 32, 1>}, {pipeline_mode = #tpu.pipeline_mode<synchronous>, transform_indices = @transform_9, window_bounds = array<i64: 2, 32, 1>}, {pipeline_mode = #tpu.pipeline_mode<synchronous>, transform_indices = @transform_10, window_bounds = array<i64: 2, 1>}, {pipeline_mode = #tpu.pipeline_mode<synchronous>, transform_indices = @transform_11, window_bounds = array<i64: 2, 1>}, {transform_indices = @transform_12, window_bounds = array<i64: 1, 4, 256>}]} {
    %c0 = arith.constant 0 : index
    %c0_0 = arith.constant 0 : index
    %c0_1 = arith.constant 0 : index
    %0 = vector.load %arg2[%c0, %c0_0, %c0_1] : memref<1x4x256xf32, #tpu.memory_space<vmem>>, vector<1x4x256xf32>
    %1 = vector.shape_cast %0 : vector<1x4x256xf32> to vector<4x256xf32>
    %c0_2 = arith.constant 0 : index
    %c0_3 = arith.constant 0 : index
    %2 = vector.load %arg3[%c0_2, %c0_3] : memref<4x1xf32, #tpu.memory_space<vmem>>, vector<4x1xf32>
    %3 = vector.broadcast %2 : vector<4x1xf32> to vector<4x256xf32>
    %4 = arith.mulf %1, %3 : vector<4x256xf32>
    %c0_4 = arith.constant 0 : index
    %c0_5 = arith.constant 0 : index
    %5 = vector.load %arg4[%c0_4, %c0_5] : memref<4x1xf32, #tpu.memory_space<vmem>>, vector<4x1xf32>
    %6 = vector.broadcast %5 : vector<4x1xf32> to vector<4x256xf32>
    %7 = arith.addf %4, %6 : vector<4x256xf32>
    %c0_6 = arith.constant 0 : index
    %c0_7 = arith.constant 0 : index
    %c0_8 = arith.constant 0 : index
    %8 = vector.load %arg5[%c0_6, %c0_7, %c0_8] : memref<4x32x1xf32, #tpu.memory_space<vmem>>, vector<4x32x1xf32>
    %9 = vector.extract_strided_slice %8 {offsets = [0, 0, 0], sizes = [1, 32, 1], strides = [1, 1, 1]} : vector<4x32x1xf32> to vector<1x32x1xf32>
    %10 = vector.shape_cast %9 : vector<1x32x1xf32> to vector<32x1xf32>
    %11 = vector.extract_strided_slice %7 {offsets = [0, 0], sizes = [1, 256], strides = [1, 1]} : vector<4x256xf32> to vector<1x256xf32>
    %12 = vector.broadcast %10 : vector<32x1xf32> to vector<32x256xf32>
    %13 = vector.broadcast %11 : vector<1x256xf32> to vector<32x256xf32>
    %14 = arith.mulf %12, %13 : vector<32x256xf32>
    %15 = vector.extract_strided_slice %8 {offsets = [1, 0, 0], sizes = [1, 32, 1], strides = [1, 1, 1]} : vector<4x32x1xf32> to vector<1x32x1xf32>
    %16 = vector.shape_cast %15 : vector<1x32x1xf32> to vector<32x1xf32>
    %17 = vector.extract_strided_slice %7 {offsets = [1, 0], sizes = [1, 256], strides = [1, 1]} : vector<4x256xf32> to vector<1x256xf32>
    %18 = vector.broadcast %16 : vector<32x1xf32> to vector<32x256xf32>
    %19 = vector.broadcast %17 : vector<1x256xf32> to vector<32x256xf32>
    %20 = arith.mulf %18, %19 : vector<32x256xf32>
    %21 = arith.addf %14, %20 : vector<32x256xf32>
    %22 = vector.extract_strided_slice %8 {offsets = [2, 0, 0], sizes = [1, 32, 1], strides = [1, 1, 1]} : vector<4x32x1xf32> to vector<1x32x1xf32>
    %23 = vector.shape_cast %22 : vector<1x32x1xf32> to vector<32x1xf32>
    %24 = vector.extract_strided_slice %7 {offsets = [2, 0], sizes = [1, 256], strides = [1, 1]} : vector<4x256xf32> to vector<1x256xf32>
    %25 = vector.broadcast %23 : vector<32x1xf32> to vector<32x256xf32>
    %26 = vector.broadcast %24 : vector<1x256xf32> to vector<32x256xf32>
    %27 = arith.mulf %25, %26 : vector<32x256xf32>
    %28 = arith.addf %21, %27 : vector<32x256xf32>
    %29 = vector.extract_strided_slice %8 {offsets = [3, 0, 0], sizes = [1, 32, 1], strides = [1, 1, 1]} : vector<4x32x1xf32> to vector<1x32x1xf32>
    %30 = vector.shape_cast %29 : vector<1x32x1xf32> to vector<32x1xf32>
    %31 = vector.extract_strided_slice %7 {offsets = [3, 0], sizes = [1, 256], strides = [1, 1]} : vector<4x256xf32> to vector<1x256xf32>
    %32 = vector.broadcast %30 : vector<32x1xf32> to vector<32x256xf32>
    %33 = vector.broadcast %31 : vector<1x256xf32> to vector<32x256xf32>
    %34 = arith.mulf %32, %33 : vector<32x256xf32>
    %35 = arith.addf %28, %34 : vector<32x256xf32>
    %c0_9 = arith.constant 0 : index
    %c0_10 = arith.constant 0 : index
    %36 = vector.load %arg6[%c0_9, %c0_10] : memref<32x1xf32, #tpu.memory_space<vmem>>, vector<32x1xf32>
    %37 = vector.broadcast %36 : vector<32x1xf32> to vector<32x256xf32>
    %38 = arith.mulf %35, %37 : vector<32x256xf32>
    %c0_11 = arith.constant 0 : index
    %c0_12 = arith.constant 0 : index
    %39 = vector.load %arg7[%c0_11, %c0_12] : memref<32x1xf32, #tpu.memory_space<vmem>>, vector<32x1xf32>
    %40 = vector.broadcast %39 : vector<32x1xf32> to vector<32x256xf32>
    %41 = arith.addf %38, %40 : vector<32x256xf32>
    %cst = arith.constant 0.000000e+00 : f32
    %42 = vector.broadcast %cst : f32 to vector<32x256xf32>
    %43 = arith.maximumf %41, %42 : vector<32x256xf32>
    %c0_13 = arith.constant 0 : index
    %c0_14 = arith.constant 0 : index
    %44 = vector.load %arg8[%c0_13, %c0_14] : memref<32x32xf32, #tpu.memory_space<vmem>>, vector<32x32xf32>
    %cst_15 = arith.constant dense<0.000000e+00> : vector<32x256xf32>
    %45 = tpu.matmul %44, %43, %cst_15 {dimension_numbers = #tpu.dot_dimension_numbers<[1], [0], [0], [1], [0, 0, 1, 1], [], []>} : vector<32x32xf32>, vector<32x256xf32>, vector<32x256xf32> -> vector<32x256xf32>
    %c0_16 = arith.constant 0 : index
    %c0_17 = arith.constant 0 : index
    %46 = vector.load %arg9[%c0_16, %c0_17] : memref<32x1xf32, #tpu.memory_space<vmem>>, vector<32x1xf32>
    %47 = vector.broadcast %46 : vector<32x1xf32> to vector<32x256xf32>
    %48 = arith.mulf %45, %47 : vector<32x256xf32>
    %c0_18 = arith.constant 0 : index
    %c0_19 = arith.constant 0 : index
    %49 = vector.load %arg10[%c0_18, %c0_19] : memref<32x1xf32, #tpu.memory_space<vmem>>, vector<32x1xf32>
    %50 = vector.broadcast %49 : vector<32x1xf32> to vector<32x256xf32>
    %51 = arith.addf %48, %50 : vector<32x256xf32>
    %cst_20 = arith.constant 0.000000e+00 : f32
    %52 = vector.broadcast %cst_20 : f32 to vector<32x256xf32>
    %53 = arith.maximumf %51, %52 : vector<32x256xf32>
    %c0_21 = arith.constant 0 : index
    %c0_22 = arith.constant 0 : index
    %c0_23 = arith.constant 0 : index
    %54 = vector.load %arg11[%c0_21, %c0_22, %c0_23] : memref<2x32x1xf32, #tpu.memory_space<vmem>>, vector<2x32x1xf32>
    %55 = vector.extract_strided_slice %7 {offsets = [3, 0], sizes = [1, 256], strides = [1, 1]} : vector<4x256xf32> to vector<1x256xf32>
    %c0_24 = arith.constant 0 : index
    %c0_25 = arith.constant 0 : index
    %c0_26 = arith.constant 0 : index
    %56 = vector.load %arg14[%c0_24, %c0_25, %c0_26] : memref<1x4x256xf32, #tpu.memory_space<vmem>>, vector<1x1x256xf32>
    %57 = vector.shape_cast %56 : vector<1x1x256xf32> to vector<1x256xf32>
    %58 = vector.shape_cast %55 : vector<1x256xf32> to vector<1x1x256xf32>
    tpu.vector_store %arg14[%c0_24, %c0_25, %c0_26], %58 {strides = array<i32>} : memref<1x4x256xf32, #tpu.memory_space<vmem>>, vector<1x1x256xf32>,
    %59 = vector.extract_strided_slice %7 {offsets = [2, 0], sizes = [1, 256], strides = [1, 1]} : vector<4x256xf32> to vector<1x256xf32>
    %c0_27 = arith.constant 0 : index
    %c1 = arith.constant 1 : index
    %c0_28 = arith.constant 0 : index
    %60 = vector.load %arg14[%c0_27, %c1, %c0_28] : memref<1x4x256xf32, #tpu.memory_space<vmem>>, vector<1x1x256xf32>
    %61 = vector.shape_cast %60 : vector<1x1x256xf32> to vector<1x256xf32>
    %62 = vector.shape_cast %59 : vector<1x256xf32> to vector<1x1x256xf32>
    tpu.vector_store %arg14[%c0_27, %c1, %c0_28], %62 {strides = array<i32>} : memref<1x4x256xf32, #tpu.memory_space<vmem>>, vector<1x1x256xf32>,
    %63 = vector.extract_strided_slice %7 {offsets = [1, 0], sizes = [1, 256], strides = [1, 1]} : vector<4x256xf32> to vector<1x256xf32>
    %64 = vector.extract_strided_slice %54 {offsets = [0, 0, 0], sizes = [1, 32, 1], strides = [1, 1, 1]} : vector<2x32x1xf32> to vector<1x32x1xf32>
    %65 = vector.shape_cast %64 : vector<1x32x1xf32> to vector<32x1xf32>
    %66 = vector.broadcast %65 : vector<32x1xf32> to vector<32x256xf32>
    %67 = arith.mulf %66, %53 : vector<32x256xf32>
    %cst_29 = arith.constant dense<0.000000e+00> : vector<256xf32>
    %68 = vector.multi_reduction <add>, %67, %cst_29 [0] : vector<32x256xf32> to vector<256xf32>
    %69 = vector.shape_cast %68 : vector<256xf32> to vector<1x256xf32>
    %c0_30 = arith.constant 0 : index
    %c0_31 = arith.constant 0 : index
    %70 = vector.load %arg12[%c0_30, %c0_31] : memref<2x1xf32, #tpu.memory_space<vmem>>, vector<1x1xf32>
    %71 = vector.broadcast %70 : vector<1x1xf32> to vector<1x256xf32>
    %72 = arith.addf %69, %71 : vector<1x256xf32>
    %c0_32 = arith.constant 0 : index
    %c0_33 = arith.constant 0 : index
    %73 = vector.load %arg13[%c0_32, %c0_33] : memref<2x1xf32, #tpu.memory_space<vmem>>, vector<1x1xf32>
    %74 = vector.broadcast %73 : vector<1x1xf32> to vector<1x256xf32>
    %75 = arith.mulf %72, %74 : vector<1x256xf32>
    %76 = arith.addf %63, %75 : vector<1x256xf32>
    %c0_34 = arith.constant 0 : index
    %c2 = arith.constant 2 : index
    %c0_35 = arith.constant 0 : index
    %77 = vector.load %arg14[%c0_34, %c2, %c0_35] : memref<1x4x256xf32, #tpu.memory_space<vmem>>, vector<1x1x256xf32>
    %78 = vector.shape_cast %77 : vector<1x1x256xf32> to vector<1x256xf32>
    %79 = vector.shape_cast %76 : vector<1x256xf32> to vector<1x1x256xf32>
    tpu.vector_store %arg14[%c0_34, %c2, %c0_35], %79 {strides = array<i32>} : memref<1x4x256xf32, #tpu.memory_space<vmem>>, vector<1x1x256xf32>,
    %80 = vector.extract_strided_slice %7 {offsets = [0, 0], sizes = [1, 256], strides = [1, 1]} : vector<4x256xf32> to vector<1x256xf32>
    %81 = vector.extract_strided_slice %54 {offsets = [1, 0, 0], sizes = [1, 32, 1], strides = [1, 1, 1]} : vector<2x32x1xf32> to vector<1x32x1xf32>
    %82 = vector.shape_cast %81 : vector<1x32x1xf32> to vector<32x1xf32>
    %83 = vector.broadcast %82 : vector<32x1xf32> to vector<32x256xf32>
    %84 = arith.mulf %83, %53 : vector<32x256xf32>
    %cst_36 = arith.constant dense<0.000000e+00> : vector<256xf32>
    %85 = vector.multi_reduction <add>, %84, %cst_36 [0] : vector<32x256xf32> to vector<256xf32>
    %86 = vector.shape_cast %85 : vector<256xf32> to vector<1x256xf32>
    %c1_37 = arith.constant 1 : index
    %c0_38 = arith.constant 0 : index
    %87 = vector.load %arg12[%c1_37, %c0_38] : memref<2x1xf32, #tpu.memory_space<vmem>>, vector<1x1xf32>
    %88 = vector.broadcast %87 : vector<1x1xf32> to vector<1x256xf32>
    %89 = arith.addf %86, %88 : vector<1x256xf32>
    %c1_39 = arith.constant 1 : index
    %c0_40 = arith.constant 0 : index
    %90 = vector.load %arg13[%c1_39, %c0_40] : memref<2x1xf32, #tpu.memory_space<vmem>>, vector<1x1xf32>
    %91 = vector.broadcast %90 : vector<1x1xf32> to vector<1x256xf32>
    %92 = arith.mulf %89, %91 : vector<1x256xf32>
    %93 = arith.addf %80, %92 : vector<1x256xf32>
    %c0_41 = arith.constant 0 : index
    %c3 = arith.constant 3 : index
    %c0_42 = arith.constant 0 : index
    %94 = vector.load %arg14[%c0_41, %c3, %c0_42] : memref<1x4x256xf32, #tpu.memory_space<vmem>>, vector<1x1x256xf32>
    %95 = vector.shape_cast %94 : vector<1x1x256xf32> to vector<1x256xf32>
    %96 = vector.shape_cast %93 : vector<1x256xf32> to vector<1x1x256xf32>
    tpu.vector_store %arg14[%c0_41, %c3, %c0_42], %96 {strides = array<i32>} : memref<1x4x256xf32, #tpu.memory_space<vmem>>, vector<1x1x256xf32>,
    return
  }
  func.func @transform_0(%arg0: i32, %arg1: i32) -> (i32, i32, i32) {
    %c0_i32 = arith.constant 0 : i32
    %c0_i32_0 = arith.constant 0 : i32
    return %arg0, %c0_i32, %arg1 : i32, i32, i32
  }
  func.func @transform_1(%arg0: i32, %arg1: i32) -> (i32, i32) {
    %c0_i32 = arith.constant 0 : i32
    %c0_i32_0 = arith.constant 0 : i32
    %c0_i32_1 = arith.constant 0 : i32
    return %c0_i32, %c0_i32_0 : i32, i32
  }
  func.func @transform_2(%arg0: i32, %arg1: i32) -> (i32, i32) {
    %c0_i32 = arith.constant 0 : i32
    %c0_i32_0 = arith.constant 0 : i32
    %c0_i32_1 = arith.constant 0 : i32
    return %c0_i32, %c0_i32_0 : i32, i32
  }
  func.func @transform_3(%arg0: i32, %arg1: i32) -> (i32, i32, i32) {
    %c0_i32 = arith.constant 0 : i32
    %c0_i32_0 = arith.constant 0 : i32
    %c0_i32_1 = arith.constant 0 : i32
    %c0_i32_2 = arith.constant 0 : i32
    return %c0_i32, %c0_i32_0, %c0_i32_1 : i32, i32, i32
  }
  func.func @transform_4(%arg0: i32, %arg1: i32) -> (i32, i32) {
    %c0_i32 = arith.constant 0 : i32
    %c0_i32_0 = arith.constant 0 : i32
    %c0_i32_1 = arith.constant 0 : i32
    return %c0_i32, %c0_i32_0 : i32, i32
  }
  func.func @transform_5(%arg0: i32, %arg1: i32) -> (i32, i32) {
    %c0_i32 = arith.constant 0 : i32
    %c0_i32_0 = arith.constant 0 : i32
    %c0_i32_1 = arith.constant 0 : i32
    return %c0_i32, %c0_i32_0 : i32, i32
  }
  func.func @transform_6(%arg0: i32, %arg1: i32) -> (i32, i32) {
    %c0_i32 = arith.constant 0 : i32
    %c0_i32_0 = arith.constant 0 : i32
    %c0_i32_1 = arith.constant 0 : i32
    return %c0_i32, %c0_i32_0 : i32, i32
  }
  func.func @transform_7(%arg0: i32, %arg1: i32) -> (i32, i32) {
    %c0_i32 = arith.constant 0 : i32
    %c0_i32_0 = arith.constant 0 : i32
    %c0_i32_1 = arith.constant 0 : i32
    return %c0_i32, %c0_i32_0 : i32, i32
  }
  func.func @transform_8(%arg0: i32, %arg1: i32) -> (i32, i32) {
    %c0_i32 = arith.constant 0 : i32
    %c0_i32_0 = arith.constant 0 : i32
    %c0_i32_1 = arith.constant 0 : i32
    return %c0_i32, %c0_i32_0 : i32, i32
  }
  func.func @transform_9(%arg0: i32, %arg1: i32) -> (i32, i32, i32) {
    %c0_i32 = arith.constant 0 : i32
    %c0_i32_0 = arith.constant 0 : i32
    %c0_i32_1 = arith.constant 0 : i32
    %c0_i32_2 = arith.constant 0 : i32
    return %c0_i32, %c0_i32_0, %c0_i32_1 : i32, i32, i32
  }
  func.func @transform_10(%arg0: i32, %arg1: i32) -> (i32, i32) {
    %c0_i32 = arith.constant 0 : i32
    %c0_i32_0 = arith.constant 0 : i32
    %c0_i32_1 = arith.constant 0 : i32
    return %c0_i32, %c0_i32_0 : i32, i32
  }
  func.func @transform_11(%arg0: i32, %arg1: i32) -> (i32, i32) {
    %c0_i32 = arith.constant 0 : i32
    %c0_i32_0 = arith.constant 0 : i32
    %c0_i32_1 = arith.constant 0 : i32
    return %c0_i32, %c0_i32_0 : i32, i32
  }
  func.func @transform_12(%arg0: i32, %arg1: i32) -> (i32, i32, i32) {
    %c0_i32 = arith.constant 0 : i32
    %c0_i32_0 = arith.constant 0 : i32
    return %arg0, %c0_i32, %arg1 : i32, i32, i32
  }
}

</mosaic_0001>

<bundles_post_ra>
// kernel: flow_forward.4
= control target key start
LH: loop header
LB: loop body
LE: loop exit
PB: predicated region body
PF: predicated region fallthrough
CT: control target
= control target key end

     0   :  { %s315_s9 = smov 0   ;;  %s317_s10 = smov 0   ;;  %s363_s0 = inlined_call_operand.vmem [shape: f32[2,4,256], index: 0, kind: input, shape index: {}]   ;;  %s364_s1 = inlined_call_operand.vmem [shape: f32[4,1], index: 1, kind: output, shape index: {0}]   ;;  %s365_s2 = inlined_call_operand.vmem [shape: f32[4,1], index: 2, kind: output, shape index: {1}]  }
   0x1   :  { %s319_s11 = smov 0  }
   0x2 LB: > { %s25_s12 = sadd.s32 1, %s293_s10  ;;  %p241_p0 = scmp.ge.s32.totalorder %s297_s11, 1  ;;  %s297_s11 = sphi %s319_s11, %s13_s11   ;;  %s293_s10 = sphi %s317_s10, %s367_s10   ;;  %s289_s9 = sphi %s315_s9, %s366_s9  }
   0x3   : > { %p27_p1 = scmp.ge.s32.totalorder %s25_s12, 2  ;;  %p124_p2 = scmp.lt.s32.totalorder %s297_s11, 3 }
   0x5   : > { %s369_s12 = smov (%p27_p1, %s25_s12), 0  ;;  %p125_p3 = pnand %p241_p0, %p124_p2 }
   0x6   : > { %p146_p4 = scmp.lt.s32.totalorder (!%p125_p3), %s289_s9, 1  ;;  %p155_p5 = scmp.eq.s32.totalorder (!%p125_p3), %s289_s9, 0 }
   0x7   : > { %128 = sbr.rel (%p125_p3) target bundleno = 168 (0xa8), region = 24 }
   0xc   : > { %s371_s9 = smov (!%p146_p4, %s289_s9), 1  ;;  %160 = sbr.rel (!%p155_p5) target bundleno = 17 (0x11), region = 28  ;;  %vm161_vm0 = vcmask (%p155_p5), 3072   ;;  %v299_v0 = vmov (%p155_p5), 0.0  }
   0xd   : > { %s247_s13 = sshll.u32 %s371_s9, 3  ;;  %162 = vst.msk [vmem:[%s364_s1] sm:$0xf] (%p155_p5), %vm161_vm0, %v299_v0  ;;  %163 = vst.msk [vmem:[%s365_s2] sm:$0xf] (%p155_p5), %vm161_vm0, %v299_v0 }
   0xe   : > { %s153_s16 = scalar_lea.vmem %s363_s0, %s247_s13 }
  0x11 PF: > { %v164_v1 = vld [vmem:[%s153_s16] sm:$0xff]  ;;  %vm169_vm1 = vcmask 1043456   ;;  %vm176_vm2 = vcmask 3072  }
  0x12   : > { %v167_v2 = vcombine.high %v164_v1, %v164_v1  ;;  %v170_v3 = vsel %vm169_vm1, %v164_v1, 0.0  ;;  %v179_v4 = vmul.f32 %v164_v1, %v164_v1 }
  0x14   : > { %v171_v5 = vsel %vm169_vm1, %v167_v2, 0.0  ;;  %v181_v6 = vcombine.high %v179_v4, %v179_v4  ;;  %v183_v7 = vsel %vm169_vm1, %v179_v4, 0.0  ;;  %v165_v11 = vld [vmem:[%s364_s1] sm:$0xf] }
  0x15   : > { %v172_v8 = vadd.f32 %v171_v5, %v170_v3  ;;  %v178_v14 = vld [vmem:[%s365_s2] sm:$0xf] }
  0x16   : > { %v184_v9 = vsel %vm169_vm1, %v181_v6, 0.0 }
  0x17   : > { %173 = vadd.xlane.f32.xlu0 %v172_v8  ;;  %v185_v10 = vadd.f32 %v184_v9, %v183_v7 }
  0x1b   : > { %186 = vadd.xlane.f32.xlu0 %v185_v10 }
  0xa0   : > { %v174_v12 = vpop.xlane.xlu0 %173 }
  0xa1   : > { %v175_v13 = vadd.f32 %v174_v12, %v165_v11 }
  0xa3   : > { %177 = vst.msk [vmem:[%s364_s1] sm:$0xf] %vm176_vm2, %v175_v13 }
  0xa4   : > { %v187_v15 = vpop.xlane.xlu0 %186 }
  0xa5   : > { %v188_v16 = vadd.f32 %v187_v15, %v178_v14 }
  0xa7   : > { %189 = vst.msk [vmem:[%s365_s2] sm:$0xf] %vm176_vm2, %v188_v16 }
  0xa8 PF: > { %s13_s11 = sadd.s32 1, %s297_s11   ;;  %s366_s9 = smov %s293_s10 }
  0xa9   : > { %p10_p6 = scmp.ge.s32.totalorder %s13_s11, 4   ;;  %s367_s10 = smov %s369_s12 }
  0xab   :  { %12 = sbr.rel (!%p10_p6) target bundleno = 2 (0x2), region = 62 }

// kernel: flow_forward.5
= control target key start
LH: loop header
LB: loop body
LE: loop exit
PB: predicated region body
PF: predicated region fallthrough
CT: control target
= control target key end

     0   :  { %s707_s18 = smov 0   ;;  %s709_s19 = smov 0   ;;  %s874_s0 = inlined_call_operand.vmem [shape: f32[2,4,256], index: 0, kind: input, shape index: {}]   ;;  %s875_s1 = inlined_call_operand.vmem [shape: f32[4,1], index: 1, kind: input, shape index: {}]   ;;  %s876_s2 = inlined_call_operand.vmem [shape: f32[4,1], index: 2, kind: input, shape index: {}]   ;;  %s877_s3 = inlined_call_operand.vmem [shape: f32[4,32,1], index: 3, kind: input, shape index: {}]   ;;  %s878_s4 = inlined_call_operand.vmem [shape: f32[32,1], index: 4, kind: output, shape index: {0}]   ;;  %s879_s5 = inlined_call_operand.vmem [shape: f32[32,1], index: 5, kind: output, shape index: {1}]  }
   0x1   :  { %s711_s20 = smov 0  }
   0x2 LB: > { %s28_s21 = sadd.s32 1, %s668_s19  ;;  %p613_p0 = scmp.ge.s32.totalorder %s672_s20, 1  ;;  %s672_s20 = sphi %s711_s20, %s16_s20   ;;  %s668_s19 = sphi %s709_s19, %s881_s19   ;;  %s664_s18 = sphi %s707_s18, %s880_s18  }
   0x3   : > { %p30_p1 = scmp.ge.s32.totalorder %s28_s21, 2  ;;  %p199_p2 = scmp.lt.s32.totalorder %s672_s20, 3 }
   0x5   : > { %s883_s21 = smov (%p30_p1, %s28_s21), 0  ;;  %p200_p3 = pnand %p613_p0, %p199_p2 }
   0x6   : > { %p227_p4 = scmp.lt.s32.totalorder (!%p200_p3), %s664_s18, 1  ;;  %p236_p5 = scmp.eq.s32.totalorder (!%p200_p3), %s664_s18, 0 }
   0x7   : > { %203 = sbr.rel (%p200_p3) target bundleno = 335 (0x14f), region = 36 }
   0xc   : > { %s885_s18 = smov (!%p227_p4, %s664_s18), 1  ;;  %241 = sbr.rel (!%p236_p5) target bundleno = 17 (0x11), region = 40  ;;  %vm242_vm0 = vcmask (%p236_p5), 7168   ;;  %v674_v0 = vmov (%p236_p5), 0.0  }
   0xd   : > { %s619_s22 = sshll.u32 %s885_s18, 3  ;;  %243 = vst.msk [vmem:[%s878_s4] sm:$0xff] (%p236_p5), %vm242_vm0, %v674_v0  ;;  %244 = vst.msk [vmem:[%s878_s4 + $0x8] sm:$0xff] (%p236_p5), %vm242_vm0, %v674_v0 }
   0xe   : > { %s728_s25 = scalar_lea.vmem %s874_s0, %s619_s22  ;;  %245 = vst.msk [vmem:[%s878_s4 + $0x10] sm:$0xff] (%p236_p5), %vm242_vm0, %v674_v0  ;;  %246 = vst.msk [vmem:[%s878_s4 + $0x18] sm:$0xff] (%p236_p5), %vm242_vm0, %v674_v0 }
   0xf   : > { %247 = vst.msk [vmem:[%s879_s5] sm:$0xff] (%p236_p5), %vm242_vm0, %v674_v0  ;;  %248 = vst.msk [vmem:[%s879_s5 + $0x8] sm:$0xff] (%p236_p5), %vm242_vm0, %v674_v0 }
  0x10   : > { %249 = vst.msk [vmem:[%s879_s5 + $0x10] sm:$0xff] (%p236_p5), %vm242_vm0, %v674_v0  ;;  %250 = vst.msk [vmem:[%s879_s5 + $0x18] sm:$0xff] (%p236_p5), %vm242_vm0, %v674_v0 }
  0x11 PF: > { %v280_v1 = vld [vmem:[%s877_s3] sm:$0xff]  ;;  %v675_v3 = vmov 0   ;;  %v281_v4 = vld [vmem:[%s877_s3 + $0x8] sm:$0xff]  ;;  %v283_v6 = vld [vmem:[%s877_s3 + $0x18] sm:$0xff]  ;;  %v676_v20 = vmov 839922192   ;;  %v260_v22 = vlaneseq }
  0x12   : > { %v252_v2 = vld [vmem:[%s875_s1] sm:$0xf]  ;;  %649 = vset.pattern.permute.xlu1 %v675_v3  ;;  %648 = vset.pattern.permute.xlu0 %v675_v3  ;;  %v282_v7 = vld [vmem:[%s877_s3 + $0x10] sm:$0xff]  ;;  %v285_v8 = vld [vmem:[%s877_s3 + $0x28] sm:$0xff]  ;;  %v258_v21 = vunpack.c.l.s4 %v676_v20  ;;  %vm525_vm1 = vcmask 7168  }
  0x13   : > { %298 = vperm.xlu1 %649, %v280_v1   ;;  %255 = vperm.xlu0 %648, %v252_v2   ;;  %v266_v5 = vld [vmem:[%s876_s2] sm:$0xf]  ;;  %v287_v10 = vld [vmem:[%s877_s3 + $0x38] sm:$0xff]  ;;  %v286_v11 = vld [vmem:[%s877_s3 + $0x30] sm:$0xff]  ;;  %v261_v24 = vshrl.u32 %v260_v22, 7 }
  0x14   : > { %v284_v9 = vld [vmem:[%s877_s3 + $0x20] sm:$0xff]  ;;  %v289_v12 = vld [vmem:[%s877_s3 + $0x48] sm:$0xff]  ;;  %v291_v14 = vld [vmem:[%s877_s3 + $0x58] sm:$0xff]  ;;  %v259_v23 = vunpack.c.0.s8 %v258_v21 }
  0x15   : > { %v288_v13 = vld [vmem:[%s877_s3 + $0x40] sm:$0xff]  ;;  %v290_v15 = vld [vmem:[%s877_s3 + $0x50] sm:$0xff]  ;;  %v293_v16 = vld [vmem:[%s877_s3 + $0x68] sm:$0xff]  ;;  %v319_v35 = vsub.s32 0, %v261_v24  ;;  %v323_v36 = vsub.s32 4, %v261_v24  ;;  %v365_v39 = vsub.s32 1, %v261_v24 }
  0x16   : > { %v292_v17 = vld [vmem:[%s877_s3 + $0x60] sm:$0xff]  ;;  %v295_v18 = vld [vmem:[%s877_s3 + $0x78] sm:$0xff]  ;;  %v294_v19 = vld [vmem:[%s877_s3 + $0x70] sm:$0xff]  ;;  %v262_v25 = vsub.s32 %v259_v23, %v261_v24  ;;  %v369_v40 = vsub.s32 5, %v261_v24  ;;  %v419_v45 = vsub.s32 2, %v261_v24  ;;  %v423_v46 = vsub.s32 6, %v261_v24 }
  0x17   : > { %303 = vperm.xlu1 %649, %v281_v4   ;;  %269 = vperm.xlu0 %648, %v266_v5   ;;  %v251_v29 = vld [vmem:[%s728_s25] sm:$0xff]  ;;  %v473_v49 = vsub.s32 3, %v261_v24  ;;  %v477_v50 = vsub.s32 7, %v261_v24 }
  0x1b   : > { %313 = vperm.xlu1 %649, %v283_v6   ;;  %308 = vperm.xlu0 %648, %v282_v7  }
  0x1f   : > { %350 = vperm.xlu1 %649, %v285_v8   ;;  %345 = vperm.xlu0 %648, %v284_v9  }
  0x23   : > { %360 = vperm.xlu1 %649, %v287_v10   ;;  %355 = vperm.xlu0 %648, %v286_v11  }
  0x27   : > { %404 = vperm.xlu1 %649, %v289_v12   ;;  %399 = vperm.xlu0 %648, %v288_v13  }
  0x2b   : > { %414 = vperm.xlu1 %649, %v291_v14   ;;  %409 = vperm.xlu0 %648, %v290_v15  }
  0x2f   : > { %458 = vperm.xlu1 %649, %v293_v16   ;;  %453 = vperm.xlu0 %648, %v292_v17  }
  0x33   : > { %468 = vperm.xlu1 %649, %v295_v18   ;;  %463 = vperm.xlu0 %648, %v294_v19  }
  0x8e   : > { %v299_v26 = vpop.permute.xlu1 %298  ;;  %v256_v27 = vpop.permute.xlu0 %255 }
  0x8f   : > { %v263_v28 = vrot.slane %v256_v27, %v262_v25 }
  0x91   : > { %v265_v33 = vmul.f32 %v263_v28, %v251_v29 }
  0x92   : > { %v304_v30 = vpop.permute.xlu1 %303  ;;  %v270_v31 = vpop.permute.xlu0 %269 }
  0x93   : > { %v277_v32 = vrot.slane %v270_v31, %v262_v25 }
  0x95   : > { %v279_v34 = vadd.f32 %v277_v32, %v265_v33 }
  0x96   : > { %v314_v37 = vpop.permute.xlu1 %313  ;;  %v309_v38 = vpop.permute.xlu0 %308 }
  0x97   : > { %v320_v41 = vrot.slane %v279_v34, %v319_v35  ;;  %v324_v42 = vrot.slane %v279_v34, %v323_v36  ;;  %v366_v47 = vrot.slane %v279_v34, %v365_v39  ;;  %v370_v48 = vrot.slane %v279_v34, %v369_v40 }
  0x98   : > { %v420_v55 = vrot.slane %v279_v34, %v419_v45  ;;  %v424_v56 = vrot.slane %v279_v34, %v423_v46  ;;  %v474_v59 = vrot.slane %v279_v34, %v473_v49  ;;  %v478_v60 = vrot.slane %v279_v34, %v477_v50 }
  0x99   : > { %v330_v51 = vrot.slane %v320_v41, %v319_v35  ;;  %v334_v52 = vrot.slane %v324_v42, %v319_v35  ;;  %v376_v57 = vrot.slane %v366_v47, %v365_v39  ;;  %v380_v58 = vrot.slane %v370_v48, %v365_v39 }
  0x9a   : > { %v351_v43 = vpop.permute.xlu1 %350  ;;  %v346_v44 = vpop.permute.xlu0 %345  ;;  %v430_v0 = vrot.slane %v420_v55, %v419_v45  ;;  %v434_v1 = vrot.slane %v424_v56, %v419_v45  ;;  %v484_v11 = vrot.slane %v474_v59, %v473_v49  ;;  %v488_v12 = vrot.slane %v478_v60, %v473_v49 }
  0x9b   : > { %v337_v61 = vmul.f32 %v330_v51, %v304_v30  ;;  %v338_v62 = vmul.f32 %v334_v52, %v304_v30  ;;  %v383_v3 = vmul.f32 %v376_v57, %v351_v43  ;;  %v384_v4 = vmul.f32 %v380_v58, %v351_v43 }
  0x9c   : > { %v335_v5 = vmul.f32 %v330_v51, %v299_v26  ;;  %v381_v6 = vmul.f32 %v376_v57, %v346_v44  ;;  %v336_v7 = vmul.f32 %v334_v52, %v299_v26  ;;  %v382_v8 = vmul.f32 %v380_v58, %v346_v44 }
  0x9d   : > { %v341_v13 = vmul.f32 %v330_v51, %v314_v37  ;;  %v342_v14 = vmul.f32 %v334_v52, %v314_v37  ;;  %v339_v19 = vmul.f32 %v330_v51, %v309_v38  ;;  %v391_v20 = vadd.f32 %v383_v3, %v337_v61 }
  0x9e   : > { %v361_v53 = vpop.permute.xlu1 %360  ;;  %v356_v54 = vpop.permute.xlu0 %355  ;;  %v392_v21 = vadd.f32 %v384_v4, %v338_v62  ;;  %v389_v22 = vadd.f32 %v381_v6, %v335_v5  ;;  %v390_v23 = vadd.f32 %v382_v8, %v336_v7  ;;  %v340_v26 = vmul.f32 %v334_v52, %v309_v38 }
  0x9f   : > { %v387_v24 = vmul.f32 %v376_v57, %v361_v53  ;;  %v385_v25 = vmul.f32 %v376_v57, %v356_v54  ;;  %v386_v27 = vmul.f32 %v380_v58, %v356_v54  ;;  %v388_v28 = vmul.f32 %v380_v58, %v361_v53 }
  0xa1   : > { %v395_v42 = vadd.f32 %v387_v24, %v341_v13  ;;  %v393_v43 = vadd.f32 %v385_v25, %v339_v19  ;;  %v394_v44 = vadd.f32 %v386_v27, %v340_v26  ;;  %v396_v49 = vadd.f32 %v388_v28, %v342_v14  ;;  %v507_v24 = vld [vmem:[%s878_s4 + $0x10] sm:$0xff] }
  0xa2   : > { %v405_v63 = vpop.permute.xlu1 %404  ;;  %v400_v2 = vpop.permute.xlu0 %399 }
  0xa3   : > { %v437_v9 = vmul.f32 %v430_v0, %v405_v63  ;;  %v438_v10 = vmul.f32 %v434_v1, %v405_v63  ;;  %v435_v15 = vmul.f32 %v430_v0, %v400_v2  ;;  %v436_v16 = vmul.f32 %v434_v1, %v400_v2 }
  0xa5   : > { %v445_v29 = vadd.f32 %v437_v9, %v391_v20  ;;  %v446_v30 = vadd.f32 %v438_v10, %v392_v21  ;;  %v443_v31 = vadd.f32 %v435_v15, %v389_v22  ;;  %v444_v32 = vadd.f32 %v436_v16, %v390_v23  ;;  %v530_v23 = vld [vmem:[%s879_s5] sm:$0xff] }
  0xa6   : > { %v415_v17 = vpop.permute.xlu1 %414  ;;  %v410_v18 = vpop.permute.xlu0 %409 }
  0xa7   : > { %v439_v33 = vmul.f32 %v430_v0, %v410_v18  ;;  %v440_v34 = vmul.f32 %v434_v1, %v410_v18  ;;  %v441_v45 = vmul.f32 %v430_v0, %v415_v17  ;;  %v442_v50 = vmul.f32 %v434_v1, %v415_v17  ;;  %v506_v17 = vld [vmem:[%s878_s4 + $0x8] sm:$0xff]  ;;  %v505_v18 = vld [vmem:[%s878_s4] sm:$0xff] }
  0xa9   : > { %v447_v51 = vadd.f32 %v439_v33, %v393_v43  ;;  %v448_v52 = vadd.f32 %v440_v34, %v394_v44  ;;  %v449_v63 = vadd.f32 %v441_v45, %v395_v42  ;;  %v450_v3 = vadd.f32 %v442_v50, %v396_v49 }
  0xaa   : > { %v459_v35 = vpop.permute.xlu1 %458  ;;  %v454_v36 = vpop.permute.xlu0 %453 }
  0xab   : > { %v491_v37 = vmul.f32 %v484_v11, %v459_v35  ;;  %v492_v39 = vmul.f32 %v488_v12, %v459_v35  ;;  %v489_v40 = vmul.f32 %v484_v11, %v454_v36  ;;  %v490_v41 = vmul.f32 %v488_v12, %v454_v36  ;;  %v531_v35 = vld [vmem:[%s879_s5 + $0x8] sm:$0xff] }
  0xad   : > { %v499_v46 = vadd.f32 %v491_v37, %v445_v29  ;;  %v500_v47 = vadd.f32 %v492_v39, %v446_v30  ;;  %v497_v38 = vadd.f32 %v489_v40, %v443_v31  ;;  %v498_v48 = vadd.f32 %v490_v41, %v444_v32  ;;  %v532_v29 = vld [vmem:[%s879_s5 + $0x10] sm:$0xff]  ;;  %v508_v30 = vld [vmem:[%s878_s4 + $0x18] sm:$0xff] }
  0xae   : > { %v469_v53 = vpop.permute.xlu1 %468  ;;  %v464_v54 = vpop.permute.xlu0 %463  ;;  %v533_v39 = vld [vmem:[%s879_s5 + $0x18] sm:$0xff] }
  0xaf   : > { %v495_v55 = vmul.f32 %v484_v11, %v469_v53  ;;  %v496_v56 = vmul.f32 %v488_v12, %v469_v53  ;;  %v493_v57 = vmul.f32 %v484_v11, %v464_v54  ;;  %v494_v58 = vmul.f32 %v488_v12, %v464_v54 }
  0xb0   : > { %v512_v59 = vadd.f32 %v500_v47, %v499_v46  ;;  %v509_v60 = vadd.f32 %v498_v48, %v497_v38  ;;  %v534_v61 = vmul.f32 %v497_v38, %v497_v38  ;;  %v535_v62 = vmul.f32 %v498_v48, %v498_v48 }
  0xb1   : > { %v501_v0 = vadd.f32 %v493_v57, %v447_v51  ;;  %v502_v2 = vadd.f32 %v494_v58, %v448_v52  ;;  %v503_v1 = vadd.f32 %v495_v55, %v449_v63  ;;  %v504_v8 = vadd.f32 %v496_v56, %v450_v3 }
  0xb2   : > { %513 = vadd.xlane.f32.xlu1 %v512_v59  ;;  %510 = vadd.xlane.f32.xlu0 %v509_v60  ;;  %v542_v5 = vadd.f32 %v535_v62, %v534_v61  ;;  %v536_v11 = vmul.f32 %v499_v46, %v499_v46  ;;  %v537_v12 = vmul.f32 %v500_v47, %v500_v47 }
  0xb3   : > { %v515_v4 = vadd.f32 %v502_v2, %v501_v0  ;;  %v538_v6 = vmul.f32 %v501_v0, %v501_v0  ;;  %v539_v7 = vmul.f32 %v502_v2, %v502_v2  ;;  %v518_v10 = vadd.f32 %v504_v8, %v503_v1 }
  0xb4   : > { %v545_v13 = vadd.f32 %v537_v12, %v536_v11  ;;  %v540_v14 = vmul.f32 %v503_v1, %v503_v1  ;;  %v541_v15 = vmul.f32 %v504_v8, %v504_v8 }
  0xb5   : > { %v548_v9 = vadd.f32 %v539_v7, %v538_v6 }
  0xb6   : > { %543 = vadd.xlane.f32.xlu1 %v542_v5  ;;  %516 = vadd.xlane.f32.xlu0 %v515_v4  ;;  %v551_v16 = vadd.f32 %v541_v15, %v540_v14 }
  0xba   : > { %549 = vadd.xlane.f32.xlu1 %v548_v9  ;;  %519 = vadd.xlane.f32.xlu0 %v518_v10 }
  0xbe   : > { %546 = vadd.xlane.f32.xlu0 %v545_v13 }
  0xc2   : > { %552 = vadd.xlane.f32.xlu0 %v551_v16 }
 0x13b   : > { %v514_v19 = vpop.xlane.xlu1 %513  ;;  %v511_v20 = vpop.xlane.xlu0 %510 }
 0x13c   : > { %v522_v21 = vadd.f32 %v514_v19, %v506_v17  ;;  %v521_v22 = vadd.f32 %v511_v20, %v505_v18 }
 0x13e   : > { %527 = vst.msk [vmem:[%s878_s4 + $0x8] sm:$0xff] %vm525_vm1, %v522_v21  ;;  %526 = vst.msk [vmem:[%s878_s4] sm:$0xff] %vm525_vm1, %v521_v22 }
 0x13f   : > { %v544_v25 = vpop.xlane.xlu1 %543  ;;  %v517_v27 = vpop.xlane.xlu0 %516 }
 0x140   : > { %v554_v26 = vadd.f32 %v544_v25, %v530_v23  ;;  %v523_v28 = vadd.f32 %v517_v27, %v507_v24 }
 0x142   : > { %558 = vst.msk [vmem:[%s879_s5] sm:$0xff] %vm525_vm1, %v554_v26  ;;  %528 = vst.msk [vmem:[%s878_s4 + $0x10] sm:$0xff] %vm525_vm1, %v523_v28 }
 0x143   : > { %v550_v31 = vpop.xlane.xlu1 %549  ;;  %v520_v32 = vpop.xlane.xlu0 %519 }
 0x144   : > { %v556_v33 = vadd.f32 %v550_v31, %v532_v29  ;;  %v524_v34 = vadd.f32 %v520_v32, %v508_v30 }
 0x146   : > { %560 = vst.msk [vmem:[%s879_s5 + $0x10] sm:$0xff] %vm525_vm1, %v556_v33  ;;  %529 = vst.msk [vmem:[%s878_s4 + $0x18] sm:$0xff] %vm525_vm1, %v524_v34 }
 0x147   : > { %v547_v36 = vpop.xlane.xlu0 %546 }
 0x148   : > { %v555_v37 = vadd.f32 %v547_v36, %v531_v35 }
 0x14a   : > { %559 = vst.msk [vmem:[%s879_s5 + $0x8] sm:$0xff] %vm525_vm1, %v555_v37 }
 0x14b   : > { %v553_v40 = vpop.xlane.xlu0 %552 }
 0x14c   : > { %v557_v41 = vadd.f32 %v553_v40, %v533_v39 }
 0x14e   : > { %561 = vst.msk [vmem:[%s879_s5 + $0x18] sm:$0xff] %vm525_vm1, %v557_v41 }
 0x14f PF: > { %s16_s20 = sadd.s32 1, %s672_s20   ;;  %s880_s18 = smov %s668_s19 }
 0x150   : > { %p13_p6 = scmp.ge.s32.totalorder %s16_s20, 4   ;;  %s881_s19 = smov %s883_s21 }
 0x152   :  { %15 = sbr.rel (!%p13_p6) target bundleno = 2 (0x2), region = 74 }

// kernel: flow_forward.6
= control target key start
LH: loop header
LB: loop body
LE: loop exit
PB: predicated region body
PF: predicated region fallthrough
CT: control target
= control target key end

     0   :  { %s995_s27 = smov 0   ;;  %s997_s28 = smov 0   ;;  %s1202_s0 = inlined_call_operand.vmem [shape: f32[2,4,256], index: 0, kind: input, shape index: {}]   ;;  %s1203_s1 = inlined_call_operand.vmem [shape: f32[4,1], index: 1, kind: input, shape index: {}]   ;;  %s1204_s2 = inlined_call_operand.vmem [shape: f32[4,1], index: 2, kind: input, shape index: {}]   ;;  %s1205_s3 = inlined_call_operand.vmem [shape: f32[4,32,1], index: 3, kind: input, shape index: {}]   ;;  %s1206_s4 = inlined_call_operand.vmem [shape: f32[32,1], index: 4, kind: input, shape index: {}]   ;;  %s1207_s5 = inlined_call_operand.vmem [shape: f32[32,1], index: 5, kind: input, shape index: {}]   ;;  %s1208_s6 = inlined_call_operand.vmem [shape: f32[32,32], index: 6, kind: input, shape index: {}]   ;;  %s1209_s7 = inlined_call_operand.vmem [shape: f32[32,1], index: 7, kind: output, shape index: {0}]   ;;  %s1210_s8 = inlined_call_operand.vmem [shape: f32[32,1], index: 8, kind: output, shape index: {1}]  }
   0x1   :  { %s999_s29 = smov 0  }
   0x2 LB: > { %s31_s30 = sadd.s32 1, %s940_s28  ;;  %p872_p0 = scmp.ge.s32.totalorder %s944_s29, 1  ;;  %s944_s29 = sphi %s999_s29, %s19_s29   ;;  %s940_s28 = sphi %s997_s28, %s1212_s28   ;;  %s936_s27 = sphi %s995_s27, %s1211_s27  }
   0x3   : > { %p33_p1 = scmp.ge.s32.totalorder %s31_s30, 2  ;;  %p274_p2 = scmp.lt.s32.totalorder %s944_s29, 3 }
   0x5   : > { %s1214_s30 = smov (%p33_p1, %s31_s30), 0  ;;  %p275_p3 = pnand %p872_p0, %p274_p2 }
   0x6   : > { %p308_p4 = scmp.lt.s32.totalorder (!%p275_p3), %s936_s27, 1  ;;  %p317_p5 = scmp.eq.s32.totalorder (!%p275_p3), %s936_s27, 0 }
   0x7   : > { %278 = sbr.rel (%p275_p3) target bundleno = 553 (0x229), region = 48 }
   0xc   : > { %s1216_s27 = smov (!%p308_p4, %s936_s27), 1  ;;  %322 = sbr.rel (!%p317_p5) target bundleno = 17 (0x11), region = 52  ;;  %vm323_vm0 = vcmask (%p317_p5), 7168   ;;  %v946_v0 = vmov (%p317_p5), 0.0  }
   0xd   : > { %s882_s9 = sshll.u32 %s1216_s27, 3  ;;  %324 = vst.msk [vmem:[%s1209_s7] sm:$0xff] (%p317_p5), %vm323_vm0, %v946_v0  ;;  %325 = vst.msk [vmem:[%s1209_s7 + $0x8] sm:$0xff] (%p317_p5), %vm323_vm0, %v946_v0 }
   0xe   : > { %s1016_s12 = scalar_lea.vmem %s1202_s0, %s882_s9  ;;  %326 = vst.msk [vmem:[%s1209_s7 + $0x10] sm:$0xff] (%p317_p5), %vm323_vm0, %v946_v0  ;;  %327 = vst.msk [vmem:[%s1209_s7 + $0x18] sm:$0xff] (%p317_p5), %vm323_vm0, %v946_v0 }
   0xf   : > { %328 = vst.msk [vmem:[%s1210_s8] sm:$0xff] (%p317_p5), %vm323_vm0, %v946_v0  ;;  %329 = vst.msk [vmem:[%s1210_s8 + $0x8] sm:$0xff] (%p317_p5), %vm323_vm0, %v946_v0 }
  0x10   : > { %330 = vst.msk [vmem:[%s1210_s8 + $0x10] sm:$0xff] (%p317_p5), %vm323_vm0, %v946_v0  ;;  %331 = vst.msk [vmem:[%s1210_s8 + $0x18] sm:$0xff] (%p317_p5), %vm323_vm0, %v946_v0 }
  0x11 PF: > { %v364_v1 = vld [vmem:[%s1205_s3 + $0x18] sm:$0xff]  ;;  %v333_v2 = vld [vmem:[%s1203_s1] sm:$0xf]  ;;  %v947_v3 = vmov 0   ;;  %v367_v6 = vld [vmem:[%s1205_s3 + $0x30] sm:$0xff]  ;;  %v948_v28 = vmov 0.0   ;;  %v341_v31 = vlaneseq }
  0x12   : > { %921 = vset.pattern.permute.xlu1 %v947_v3  ;;  %920 = vset.pattern.permute.xlu0 %v947_v3  ;;  %v368_v4 = vld [vmem:[%s1205_s3 + $0x38] sm:$0xff]  ;;  %v347_v5 = vld [vmem:[%s1204_s2] sm:$0xf]  ;;  %v363_v7 = vld [vmem:[%s1205_s3 + $0x10] sm:$0xff]  ;;  %v949_v29 = vmov 839922192  }
  0x13   : > { %394 = vperm.xlu1 %921, %v364_v1   ;;  %336 = vperm.xlu0 %920, %v333_v2   ;;  %v362_v8 = vld [vmem:[%s1205_s3 + $0x8] sm:$0xff]  ;;  %v372_v9 = vld [vmem:[%s1205_s3 + $0x58] sm:$0xff]  ;;  %v371_v10 = vld [vmem:[%s1205_s3 + $0x50] sm:$0xff]  ;;  %v339_v30 = vunpack.c.l.s4 %v949_v29  ;;  %v342_v34 = vshrl.u32 %v341_v31, 7  ;;  %vm662_vm1 = vcmask 261120   ;;  %vm784_vm2 = vcmask 7168  }
  0x14   : > { %v366_v11 = vld [vmem:[%s1205_s3 + $0x28] sm:$0xff]  ;;  %v361_v12 = vld [vmem:[%s1205_s3] sm:$0xff]  ;;  %v376_v13 = vld [vmem:[%s1205_s3 + $0x78] sm:$0xff]  ;;  %739 = vmatprep.mubr.f32.mxu0 %v948_v28  ;;  %751 = vmatprep.mubr.f32.mxu1 %v948_v28 }
  0x15   : > { %v370_v14 = vld [vmem:[%s1205_s3 + $0x48] sm:$0xff]  ;;  %v365_v15 = vld [vmem:[%s1205_s3 + $0x20] sm:$0xff]  ;;  %v375_v17 = vld [vmem:[%s1205_s3 + $0x70] sm:$0xff]  ;;  %v340_v33 = vunpack.c.0.s8 %v339_v30  ;;  %v446_v48 = vsub.s32 1, %v342_v34  ;;  %v400_v49 = vsub.s32 0, %v342_v34  ;;  %v450_v50 = vsub.s32 5, %v342_v34 }
  0x16   : > { %v369_v16 = vld [vmem:[%s1205_s3 + $0x40] sm:$0xff]  ;;  %v589_v18 = vld [vmem:[%s1206_s4 + $0x18] sm:$0xff]  ;;  %v374_v19 = vld [vmem:[%s1205_s3 + $0x68] sm:$0xff]  ;;  %v404_v51 = vsub.s32 4, %v342_v34  ;;  %v500_v58 = vsub.s32 2, %v342_v34  ;;  %v504_v61 = vsub.s32 6, %v342_v34 }
  0x17   : > { %441 = vperm.xlu1 %921, %v368_v4   ;;  %350 = vperm.xlu0 %920, %v347_v5   ;;  %v588_v20 = vld [vmem:[%s1206_s4 + $0x10] sm:$0xff]  ;;  %v373_v21 = vld [vmem:[%s1205_s3 + $0x60] sm:$0xff]  ;;  %v587_v22 = vld [vmem:[%s1206_s4 + $0x8] sm:$0xff]  ;;  %v343_v36 = vsub.s32 %v340_v33, %v342_v34  ;;  %v554_v2 = vsub.s32 3, %v342_v34  ;;  %v558_v3 = vsub.s32 7, %v342_v34 }
  0x18   : > { %v621_v23 = vld [vmem:[%s1207_s5 + $0x18] sm:$0xff]  ;;  %v586_v24 = vld [vmem:[%s1206_s4] sm:$0xff]  ;;  %v620_v25 = vld [vmem:[%s1207_s5 + $0x10] sm:$0xff] }
  0x19   : > { %v618_v26 = vld [vmem:[%s1207_s5] sm:$0xff]  ;;  %v619_v27 = vld [vmem:[%s1207_s5 + $0x8] sm:$0xff] }
  0x1a   : > { %v332_v42 = vld [vmem:[%s1016_s12] sm:$0xff] }
  0x1b   : > { %436 = vperm.xlu1 %921, %v367_v6   ;;  %389 = vperm.xlu0 %920, %v363_v7  }
  0x1f   : > { %384 = vperm.xlu1 %921, %v362_v8   ;;  %495 = vperm.xlu0 %920, %v372_v9  }
  0x23   : > { %490 = vperm.xlu1 %921, %v371_v10   ;;  %431 = vperm.xlu0 %920, %v366_v11  }
  0x27   : > { %379 = vperm.xlu1 %921, %v361_v12   ;;  %549 = vperm.xlu0 %920, %v376_v13  }
  0x2b   : > { %485 = vperm.xlu1 %921, %v370_v14   ;;  %426 = vperm.xlu0 %920, %v365_v15  }
  0x2f   : > { %480 = vperm.xlu1 %921, %v369_v16   ;;  %544 = vperm.xlu0 %920, %v375_v17  }
  0x33   : > { %607 = vperm.xlu1 %921, %v589_v18   ;;  %539 = vperm.xlu0 %920, %v374_v19  }
  0x37   : > { %602 = vperm.xlu1 %921, %v588_v20   ;;  %534 = vperm.xlu0 %920, %v373_v21  }
  0x3b   : > { %597 = vperm.xlu1 %921, %v587_v22   ;;  %639 = vperm.xlu0 %920, %v621_v23  }
  0x3f   : > { %592 = vperm.xlu1 %921, %v586_v24   ;;  %634 = vperm.xlu0 %920, %v620_v25  }
  0x43   : > { %624 = vperm.xlu1 %921, %v618_v26   ;;  %629 = vperm.xlu0 %920, %v619_v27  }
  0x8e   : > { %v395_v32 = vpop.permute.xlu1 %394  ;;  %v337_v35 = vpop.permute.xlu0 %336 }
  0x8f   : > { %v344_v39 = vrot.slane %v337_v35, %v343_v36 }
  0x91   : > { %v346_v44 = vmul.f32 %v344_v39, %v332_v42 }
  0x92   : > { %v442_v37 = vpop.permute.xlu1 %441  ;;  %v351_v38 = vpop.permute.xlu0 %350 }
  0x93   : > { %v358_v43 = vrot.slane %v351_v38, %v343_v36 }
  0x95   : > { %v360_v47 = vadd.f32 %v358_v43, %v346_v44 }
  0x96   : > { %v437_v40 = vpop.permute.xlu1 %436  ;;  %v390_v41 = vpop.permute.xlu0 %389 }
  0x97   : > { %v447_v54 = vrot.slane %v360_v47, %v446_v48  ;;  %v401_v55 = vrot.slane %v360_v47, %v400_v49  ;;  %v451_v56 = vrot.slane %v360_v47, %v450_v50  ;;  %v405_v57 = vrot.slane %v360_v47, %v404_v51 }
  0x98   : > { %v501_v4 = vrot.slane %v360_v47, %v500_v58  ;;  %v505_v7 = vrot.slane %v360_v47, %v504_v61  ;;  %v555_v12 = vrot.slane %v360_v47, %v554_v2  ;;  %v559_v13 = vrot.slane %v360_v47, %v558_v3 }
  0x99   : > { %v457_v62 = vrot.slane %v447_v54, %v446_v48  ;;  %v411_v63 = vrot.slane %v401_v55, %v400_v49  ;;  %v461_v0 = vrot.slane %v451_v56, %v446_v48  ;;  %v415_v1 = vrot.slane %v405_v57, %v400_v49 }
  0x9a   : > { %v385_v45 = vpop.permute.xlu1 %384  ;;  %v496_v46 = vpop.permute.xlu0 %495  ;;  %v511_v16 = vrot.slane %v501_v4, %v500_v58  ;;  %v515_v19 = vrot.slane %v505_v7, %v500_v58  ;;  %v565_v25 = vrot.slane %v555_v12, %v554_v2  ;;  %v569_v26 = vrot.slane %v559_v13, %v554_v2 }
  0x9b   : > { %v422_v8 = vmul.f32 %v411_v63, %v395_v32  ;;  %v468_v9 = vmul.f32 %v457_v62, %v442_v37  ;;  %v423_v10 = vmul.f32 %v415_v1, %v395_v32  ;;  %v469_v11 = vmul.f32 %v461_v0, %v442_v37 }
  0x9c   : > { %v466_v14 = vmul.f32 %v457_v62, %v437_v40  ;;  %v420_v15 = vmul.f32 %v411_v63, %v390_v41  ;;  %v467_v20 = vmul.f32 %v461_v0, %v437_v40  ;;  %v421_v21 = vmul.f32 %v415_v1, %v390_v41 }
  0x9d   : > { %v476_v22 = vadd.f32 %v468_v9, %v422_v8  ;;  %v477_v23 = vadd.f32 %v469_v11, %v423_v10  ;;  %v522_v29 = vmul.f32 %v511_v16, %v496_v46  ;;  %v523_v34 = vmul.f32 %v515_v19, %v496_v46 }
  0x9e   : > { %v491_v52 = vpop.permute.xlu1 %490  ;;  %v432_v53 = vpop.permute.xlu0 %431  ;;  %v474_v27 = vadd.f32 %v466_v14, %v420_v15  ;;  %v475_v38 = vadd.f32 %v467_v20, %v421_v21  ;;  %v418_v39 = vmul.f32 %v411_v63, %v385_v45  ;;  %v419_v42 = vmul.f32 %v415_v1, %v385_v45 }
  0x9f   : > { %v520_v24 = vmul.f32 %v511_v16, %v491_v52  ;;  %v521_v30 = vmul.f32 %v515_v19, %v491_v52  ;;  %v464_v31 = vmul.f32 %v457_v62, %v432_v53  ;;  %v465_v35 = vmul.f32 %v461_v0, %v432_v53 }
  0xa0   : > { %v530_v40 = vadd.f32 %v522_v29, %v476_v22  ;;  %v531_v41 = vadd.f32 %v523_v34, %v477_v23 }
  0xa1   : > { %v528_v43 = vadd.f32 %v520_v24, %v474_v27  ;;  %v529_v48 = vadd.f32 %v521_v30, %v475_v38  ;;  %v472_v49 = vadd.f32 %v464_v31, %v418_v39  ;;  %v473_v55 = vadd.f32 %v465_v35, %v419_v42 }
  0xa2   : > { %v380_v59 = vpop.permute.xlu1 %379  ;;  %v550_v60 = vpop.permute.xlu0 %549 }
  0xa3   : > { %v576_v36 = vmul.f32 %v565_v25, %v550_v60  ;;  %v577_v37 = vmul.f32 %v569_v26, %v550_v60  ;;  %v417_v56 = vmul.f32 %v415_v1, %v380_v59  ;;  %v416_v57 = vmul.f32 %v411_v63, %v380_v59 }
  0xa5   : > { %v584_v46 = vadd.f32 %v576_v36, %v530_v40  ;;  %v585_v53 = vadd.f32 %v577_v37, %v531_v41 }
  0xa6   : > { %v486_v5 = vpop.permute.xlu1 %485  ;;  %v427_v6 = vpop.permute.xlu0 %426 }
  0xa7   : > { %v518_v44 = vmul.f32 %v511_v16, %v486_v5  ;;  %v463_v47 = vmul.f32 %v461_v0, %v427_v6  ;;  %v519_v58 = vmul.f32 %v515_v19, %v486_v5  ;;  %v462_v60 = vmul.f32 %v457_v62, %v427_v6 }
  0xa9   : > { %v526_v45 = vadd.f32 %v518_v44, %v472_v49  ;;  %v471_v2 = vadd.f32 %v463_v47, %v417_v56  ;;  %v527_v15 = vadd.f32 %v519_v58, %v473_v55  ;;  %v658_v44 = vld [vmem:[%s1208_s6] sm:$0xff]  ;;  %v660_v47 = vld [vmem:[%s1208_s6 + $0x10] sm:$0xff]  ;;  %v661_v49 = vld [vmem:[%s1208_s6 + $0x18] sm:$0xff] }
  0xaa   : > { %v481_v17 = vpop.permute.xlu1 %480  ;;  %v545_v18 = vpop.permute.xlu0 %544 }
  0xab   : > { %v574_v50 = vmul.f32 %v565_v25, %v545_v18  ;;  %v575_v51 = vmul.f32 %v569_v26, %v545_v18  ;;  %v517_v61 = vmul.f32 %v515_v19, %v481_v17  ;;  %v516_v7 = vmul.f32 %v511_v16, %v481_v17 }
  0xac   : > { %v470_v18 = vadd.f32 %v462_v60, %v416_v57 }
  0xad   : > { %v582_v8 = vadd.f32 %v574_v50, %v528_v43  ;;  %v583_v9 = vadd.f32 %v575_v51, %v529_v48  ;;  %v525_v59 = vadd.f32 %v517_v61, %v471_v2  ;;  %v659_v48 = vld [vmem:[%s1208_s6 + $0x8] sm:$0xff] }
  0xae   : > { %v608_v32 = vpop.permute.xlu1 %607  ;;  %v540_v33 = vpop.permute.xlu0 %539  ;;  %v524_v20 = vadd.f32 %v516_v7, %v470_v18 }
  0xaf   : > { %v616_v3 = vmul.f32 %v608_v32, %v584_v46  ;;  %v617_v4 = vmul.f32 %v608_v32, %v585_v53  ;;  %v572_v0 = vmul.f32 %v565_v25, %v540_v33  ;;  %v573_v12 = vmul.f32 %v569_v26, %v540_v33 }
  0xb1   : > { %v580_v21 = vadd.f32 %v572_v0, %v526_v45  ;;  %v581_v22 = vadd.f32 %v573_v12, %v527_v15 }
  0xb2   : > { %v603_v52 = vpop.permute.xlu1 %602  ;;  %v535_v54 = vpop.permute.xlu0 %534 }
  0xb3   : > { %v571_v13 = vmul.f32 %v569_v26, %v535_v54  ;;  %v570_v63 = vmul.f32 %v565_v25, %v535_v54  ;;  %v614_v62 = vmul.f32 %v603_v52, %v582_v8  ;;  %v615_v5 = vmul.f32 %v603_v52, %v583_v9 }
  0xb5   : > { %v579_v23 = vadd.f32 %v571_v13, %v525_v59  ;;  %v578_v29 = vadd.f32 %v570_v63, %v524_v20  ;;  %v764_v13 = vld [vmem:[%s1209_s7] sm:$0xff]  ;;  %v766_v59 = vld [vmem:[%s1209_s7 + $0x10] sm:$0xff]  ;;  %v767_v20 = vld [vmem:[%s1209_s7 + $0x18] sm:$0xff] }
  0xb6   : > { %v598_v10 = vpop.permute.xlu1 %597  ;;  %v640_v11 = vpop.permute.xlu0 %639 }
  0xb7   : > { %v648_v14 = vadd.f32 %v640_v11, %v616_v3  ;;  %v649_v1 = vadd.f32 %v640_v11, %v617_v4  ;;  %v612_v26 = vmul.f32 %v598_v10, %v580_v21  ;;  %v613_v30 = vmul.f32 %v598_v10, %v581_v22 }
  0xb9   : > { %v657_v6 = vmax.f32 %v649_v1, 0.0  ;;  %v656_v19 = vmax.f32 %v648_v14, 0.0  ;;  %v789_v1 = vld [vmem:[%s1210_s8] sm:$0xff] }
  0xba   : > { %v593_v16 = vpop.permute.xlu1 %592  ;;  %v635_v17 = vpop.permute.xlu0 %634 }
  0xbb   : > { %v646_v24 = vadd.f32 %v635_v17, %v614_v62  ;;  %v647_v27 = vadd.f32 %v635_v17, %v615_v5  ;;  %699 = vmatprep.subr.mxu0 %v657_v6  ;;  %884 = vmatprep.subr.mxu1 %v657_v6  ;;  %v611_v31 = vmul.f32 %v593_v16, %v579_v23  ;;  %v765_v5 = vld [vmem:[%s1209_s7 + $0x8] sm:$0xff]  ;;  %v791_v17 = vld [vmem:[%s1210_s8 + $0x10] sm:$0xff] }
  0xbc   : > { %700 = vmatpush1.msra.mxu0 %v656_v19  ;;  %888 = vmatpush1.msra.mxu1 %v656_v19  ;;  %v610_v33 = vmul.f32 %v593_v16, %v578_v29 }
  0xbd   : > { %v654_v25 = vmax.f32 %v646_v24, 0.0  ;;  %v655_v32 = vmax.f32 %v647_v27, 0.0  ;;  %v790_v24 = vld [vmem:[%s1210_s8 + $0x8] sm:$0xff] }
  0xbe   : > { %v625_v34 = vpop.permute.xlu1 %624  ;;  %v630_v35 = vpop.permute.xlu0 %629 }
  0xbf   : > { %v643_v36 = vadd.f32 %v625_v34, %v611_v31  ;;  %v644_v37 = vadd.f32 %v630_v35, %v612_v26  ;;  %v645_v38 = vadd.f32 %v630_v35, %v613_v30  ;;  %701 = vmatprep.subr.mxu0 %v655_v32  ;;  %v642_v39 = vadd.f32 %v625_v34, %v610_v33  ;;  %v792_v30 = vld [vmem:[%s1210_s8 + $0x18] sm:$0xff] }
  0xc0   : > { %885 = vmatprep.subr.mxu1 %v655_v32  ;;  %702 = vmatpush1.msra.mxu0 %v654_v25 }
  0xc1   : > { %v652_v42 = vmax.f32 %v644_v37, 0.0  ;;  %v653_v40 = vmax.f32 %v645_v38, 0.0  ;;  %889 = vmatpush1.msra.mxu1 %v654_v25  ;;  %v651_v41 = vmax.f32 %v643_v36, 0.0  ;;  %v650_v43 = vmax.f32 %v642_v39, 0.0 }
  0xc3   : > { %703 = vmatprep.subr.mxu0 %v653_v40  ;;  %886 = vmatprep.subr.mxu1 %v653_v40 }
  0xc4   : > { %704 = vmatpush1.msra.mxu0 %v652_v42  ;;  %890 = vmatpush1.msra.mxu1 %v652_v42 }
  0xc5   : > { %705 = vmatprep.subr.mxu0 %v651_v41  ;;  %887 = vmatprep.subr.mxu1 %v651_v41 }
  0xc6   : > { %706 = vmatpush1.msra.mxu0 %v650_v43  ;;  %891 = vmatpush1.msra.mxu1 %v650_v43 }
  0xc7   : > { %876 = vmatmul.mubr.msk.f32.vlgmr.msra.gmra.mxu0 %vm662_vm1, %v658_v44  ;;  %878 = vmatmul.mubr.msk.f32.vlgmr.msra.gmra.mxu1 %vm662_vm1, %v660_v47 }
  0xc8   : > { %745 = vmatprep.mubr.f32.mxu0 %v948_v28  ;;  %757 = vmatprep.mubr.f32.mxu1 %v948_v28 }
  0xcb   : > { %877 = vmatmul.mubr.msk.f32.gmra.mxu0 %vm662_vm1, %v659_v48  ;;  %879 = vmatmul.mubr.msk.f32.gmra.mxu1 %vm662_vm1, %v661_v49 }
 0x187   : > { %v741_v50 = vpop.f32.mrf.mxu0  ;;  %v753_v51 = vpop.f32.mrf.mxu1 }
 0x188   : > { %v793_v55 = vmul.f32 %v741_v50, %v741_v50  ;;  %v797_v2 = vmul.f32 %v753_v51, %v753_v51 }
 0x189   : > { %v743_v52 = vpop.f32.mrf.mxu0  ;;  %v755_v54 = vpop.f32.mrf.mxu1 }
 0x18a   : > { %v794_v56 = vmul.f32 %v743_v52, %v743_v52  ;;  %v768_v46 = vadd.f32 %v743_v52, %v741_v50  ;;  %v774_v61 = vadd.f32 %v755_v54, %v753_v51  ;;  %v798_v3 = vmul.f32 %v755_v54, %v755_v54 }
 0x18b   : > { %v747_v53 = vpop.f32.mrf.mxu0  ;;  %v759_v57 = vpop.f32.mrf.mxu1 }
 0x18c   : > { %769 = vadd.xlane.f32.xlu0 %v768_v46  ;;  %v801_v28 = vadd.f32 %v794_v56, %v793_v55  ;;  %v795_v4 = vmul.f32 %v747_v53, %v747_v53  ;;  %v807_v8 = vadd.f32 %v798_v3, %v797_v2  ;;  %v799_v9 = vmul.f32 %v759_v57, %v759_v57 }
 0x18d   : > { %v749_v58 = vpop.f32.mrf.mxu0  ;;  %v761_v45 = vpop.f32.mrf.mxu1 }
 0x18e   : > { %802 = vadd.xlane.f32.xlu1 %v801_v28  ;;  %v771_v60 = vadd.f32 %v749_v58, %v747_v53  ;;  %v796_v7 = vmul.f32 %v749_v58, %v749_v58  ;;  %v777_v0 = vadd.f32 %v761_v45, %v759_v57  ;;  %v800_v10 = vmul.f32 %v761_v45, %v761_v45 }
 0x190   : > { %775 = vadd.xlane.f32.xlu0 %v774_v61  ;;  %v804_v11 = vadd.f32 %v796_v7, %v795_v4  ;;  %v810_v12 = vadd.f32 %v800_v10, %v799_v9 }
 0x192   : > { %772 = vadd.xlane.f32.xlu1 %v771_v60 }
 0x194   : > { %778 = vadd.xlane.f32.xlu0 %v777_v0 }
 0x196   : > { %808 = vadd.xlane.f32.xlu1 %v807_v8 }
 0x198   : > { %805 = vadd.xlane.f32.xlu0 %v804_v11 }
 0x19c   : > { %811 = vadd.xlane.f32.xlu0 %v810_v12 }
 0x215   : > { %v770_v14 = vpop.xlane.xlu0 %769 }
 0x216   : > { %v780_v15 = vadd.f32 %v770_v14, %v764_v13 }
 0x217   : > { %v803_v18 = vpop.xlane.xlu1 %802 }
 0x218   : > { %785 = vst.msk [vmem:[%s1209_s7] sm:$0xff] %vm784_vm2, %v780_v15  ;;  %v813_v63 = vadd.f32 %v803_v18, %v789_v1 }
 0x219   : > { %v776_v62 = vpop.xlane.xlu0 %775 }
 0x21a   : > { %817 = vst.msk [vmem:[%s1210_s8] sm:$0xff] %vm784_vm2, %v813_v63  ;;  %v782_v6 = vadd.f32 %v776_v62, %v766_v59 }
 0x21b   : > { %v773_v19 = vpop.xlane.xlu1 %772 }
 0x21c   : > { %787 = vst.msk [vmem:[%s1209_s7 + $0x10] sm:$0xff] %vm784_vm2, %v782_v6  ;;  %v781_v21 = vadd.f32 %v773_v19, %v765_v5 }
 0x21d   : > { %v779_v16 = vpop.xlane.xlu0 %778 }
 0x21e   : > { %786 = vst.msk [vmem:[%s1209_s7 + $0x8] sm:$0xff] %vm784_vm2, %v781_v21  ;;  %v783_v22 = vadd.f32 %v779_v16, %v767_v20 }
 0x21f   : > { %v809_v23 = vpop.xlane.xlu1 %808 }
 0x220   : > { %788 = vst.msk [vmem:[%s1209_s7 + $0x18] sm:$0xff] %vm784_vm2, %v783_v22  ;;  %v815_v27 = vadd.f32 %v809_v23, %v791_v17 }
 0x221   : > { %v806_v26 = vpop.xlane.xlu0 %805 }
 0x222   : > { %819 = vst.msk [vmem:[%s1210_s8 + $0x10] sm:$0xff] %vm784_vm2, %v815_v27  ;;  %v814_v29 = vadd.f32 %v806_v26, %v790_v24 }
 0x224   : > { %818 = vst.msk [vmem:[%s1210_s8 + $0x8] sm:$0xff] %vm784_vm2, %v814_v29 }
 0x225   : > { %v812_v31 = vpop.xlane.xlu0 %811 }
 0x226   : > { %v816_v25 = vadd.f32 %v812_v31, %v792_v30 }
 0x228   : > { %820 = vst.msk [vmem:[%s1210_s8 + $0x18] sm:$0xff] %vm784_vm2, %v816_v25 }
 0x229 PF: > { %s19_s29 = sadd.s32 1, %s944_s29   ;;  %s1211_s27 = smov %s940_s28 }
 0x22a   : > { %p16_p6 = scmp.ge.s32.totalorder %s19_s29, 4   ;;  %s1212_s28 = smov %s1214_s30 }
 0x22c   :  { %18 = sbr.rel (!%p16_p6) target bundleno = 2 (0x2), region = 86 }

// kernel: flow_forward.7
= control target key start
LH: loop header
LB: loop body
LE: loop exit
PB: predicated region body
PF: predicated region fallthrough
CT: control target
= control target key end

     0   :  { %s1408_s21 = smov 0   ;;  %s1410_s22 = smov 0   ;;  %s1654_s0 = inlined_call_operand.vmem [shape: f32[2,4,256], index: 0, kind: input, shape index: {}]   ;;  %s1655_s1 = inlined_call_operand.vmem [shape: f32[4,1], index: 1, kind: input, shape index: {}]   ;;  %s1656_s2 = inlined_call_operand.vmem [shape: f32[4,1], index: 2, kind: input, shape index: {}]   ;;  %s1657_s3 = inlined_call_operand.vmem [shape: f32[4,32,1], index: 3, kind: input, shape index: {}]   ;;  %s1658_s4 = inlined_call_operand.vmem [shape: f32[32,1], index: 4, kind: input, shape index: {}]   ;;  %s1659_s5 = inlined_call_operand.vmem [shape: f32[32,1], index: 5, kind: input, shape index: {}]   ;;  %s1660_s6 = inlined_call_operand.vmem [shape: f32[32,32], index: 6, kind: input, shape index: {}]   ;;  %s1661_s7 = inlined_call_operand.vmem [shape: f32[32,1], index: 7, kind: input, shape index: {}]   ;;  %s1662_s8 = inlined_call_operand.vmem [shape: f32[32,1], index: 8, kind: input, shape index: {}]   ;;  %s1663_s9 = inlined_call_operand.vmem [shape: f32[2,32,1], index: 9, kind: input, shape index: {}]   ;;  %s1664_s10 = inlined_call_operand.vmem [shape: f32[2,1], index: 10, kind: input, shape index: {}]   ;;  %s1665_s11 = inlined_call_operand.vmem [shape: f32[2,1], index: 11, kind: input, shape index: {}]   ;;  %s1666_s12 = inlined_call_operand.vmem [shape: f32[2,4,256], index: 12, kind: output, shape index: {}]  }
   0x1   :  { %s1412_s23 = smov 0  }
   0x2 LB: > { %s34_s24 = sadd.s32 1, %s1333_s22  ;;  %p1261_p0 = scmp.ge.s32.totalorder %s1337_s23, 1  ;;  %s1337_s23 = sphi %s1412_s23, %s22_s23   ;;  %s1333_s22 = sphi %s1410_s22, %s1670_s22   ;;  %s1329_s21 = sphi %s1408_s21, %s1669_s21  }
   0x3   : > { %p36_p1 = scmp.ge.s32.totalorder %s34_s24, 2  ;;  %p383_p2 = scmp.lt.s32.totalorder %s1337_s23, 3 }
   0x5   : > { %s1672_s24 = smov (%p36_p1, %s34_s24), 0  ;;  %p384_p3 = pnand %p1261_p0, %p383_p2 }
   0x6   : > { %p434_p4 = scmp.lt.s32.totalorder (!%p384_p3), %s1329_s21, 1 }
   0x7   : > { %387 = sbr.rel (%p384_p3) target bundleno = 436 (0x1b4), region = 68 }
   0xc   : > { %v485_v0 = vld [vmem:[%s1657_s3 + $0x18] sm:$0xff]  ;;  %v454_v1 = vld [vmem:[%s1655_s1] sm:$0xf]  ;;  %v1339_v2 = vmov 0   ;;  %v488_v5 = vld [vmem:[%s1657_s3 + $0x30] sm:$0xff]  ;;  %v1340_v29 = vmov 0.0   ;;  %v462_v50 = vlaneseq }
   0xd   : > { %1314 = vset.pattern.permute.xlu1 %v1339_v2  ;;  %1313 = vset.pattern.permute.xlu0 %v1339_v2  ;;  %v489_v3 = vld [vmem:[%s1657_s3 + $0x38] sm:$0xff]  ;;  %v468_v4 = vld [vmem:[%s1656_s2] sm:$0xf]  ;;  %v484_v6 = vld [vmem:[%s1657_s3 + $0x10] sm:$0xff]  ;;  %v1341_v48 = vmov 839922192  }
   0xe   : > { %515 = vperm.xlu1 %1314, %v485_v0   ;;  %457 = vperm.xlu0 %1313, %v454_v1   ;;  %v483_v7 = vld [vmem:[%s1657_s3 + $0x8] sm:$0xff]  ;;  %v493_v8 = vld [vmem:[%s1657_s3 + $0x58] sm:$0xff]  ;;  %v492_v9 = vld [vmem:[%s1657_s3 + $0x50] sm:$0xff]  ;;  %v460_v49 = vunpack.c.l.s4 %v1341_v48  ;;  %s1674_s21 = smov (!%p434_p4, %s1329_s21), 1  ;;  %v463_v52 = vshrl.u32 %v462_v50, 7  ;;  %vm1598_vm0 = vcmp.lt.s32.totalorder %v462_v50, 256 }
   0xf   : > { %v487_v10 = vld [vmem:[%s1657_s3 + $0x28] sm:$0xff]  ;;  %v482_v11 = vld [vmem:[%s1657_s3] sm:$0xff]  ;;  %v497_v12 = vld [vmem:[%s1657_s3 + $0x78] sm:$0xff]  ;;  %860 = vmatprep.mubr.f32.mxu0 %v1340_v29  ;;  %872 = vmatprep.mubr.f32.mxu1 %v1340_v29  ;;  %s1275_s15 = sshll.u32 %s1674_s21, 3  ;;  %v1342_v58 = vmov 1966171168  }
  0x10   : > { %v491_v13 = vld [vmem:[%s1657_s3 + $0x48] sm:$0xff]  ;;  %v486_v14 = vld [vmem:[%s1657_s3 + $0x20] sm:$0xff]  ;;  %v496_v16 = vld [vmem:[%s1657_s3 + $0x70] sm:$0xff]  ;;  %v461_v51 = vunpack.c.0.s8 %v460_v49  ;;  %s441_s18 = scalar_lea.vmem %s1654_s0, %s1275_s15  ;;  %v966_v59 = vunpack.c.l.s4 %v1342_v58  ;;  %s1594_s25 = scalar_lea.vmem %s1666_s12, %s1275_s15  ;;  %vm783_vm1 = vcmask 261120  }
  0x11   : > { %v490_v15 = vld [vmem:[%s1657_s3 + $0x40] sm:$0xff]  ;;  %v710_v17 = vld [vmem:[%s1658_s4 + $0x18] sm:$0xff]  ;;  %v495_v18 = vld [vmem:[%s1657_s3 + $0x68] sm:$0xff] }
  0x12   : > { %562 = vperm.xlu1 %1314, %v489_v3   ;;  %471 = vperm.xlu0 %1313, %v468_v4   ;;  %v709_v19 = vld [vmem:[%s1658_s4 + $0x10] sm:$0xff]  ;;  %v494_v20 = vld [vmem:[%s1657_s3 + $0x60] sm:$0xff]  ;;  %v708_v21 = vld [vmem:[%s1658_s4 + $0x8] sm:$0xff]  ;;  %v464_v55 = vsub.s32 %v461_v51, %v463_v52  ;;  %v967_v1 = vunpack.c.0.s8 %v966_v59 }
  0x13   : > { %v742_v22 = vld [vmem:[%s1659_s5 + $0x18] sm:$0xff]  ;;  %v707_v23 = vld [vmem:[%s1658_s4] sm:$0xff]  ;;  %v741_v24 = vld [vmem:[%s1659_s5 + $0x10] sm:$0xff] }
  0x14   : > { %v739_v25 = vld [vmem:[%s1659_s5] sm:$0xff]  ;;  %v740_v26 = vld [vmem:[%s1659_s5 + $0x8] sm:$0xff]  ;;  %v887_v31 = vld [vmem:[%s1661_s7 + $0x10] sm:$0xff] }
  0x15   : > { %v886_v27 = vld [vmem:[%s1661_s7 + $0x8] sm:$0xff]  ;;  %v885_v28 = vld [vmem:[%s1661_s7] sm:$0xff]  ;;  %v888_v32 = vld [vmem:[%s1661_s7 + $0x18] sm:$0xff] }
  0x16   : > { %557 = vperm.xlu1 %1314, %v488_v5   ;;  %510 = vperm.xlu0 %1313, %v484_v6   ;;  %v917_v30 = vld [vmem:[%s1662_s8] sm:$0xff]  ;;  %v918_v33 = vld [vmem:[%s1662_s8 + $0x8] sm:$0xff]  ;;  %v920_v34 = vld [vmem:[%s1662_s8 + $0x18] sm:$0xff]  ;;  %v1582_v6 = vsub.s32 %v967_v1, %v463_v52 }
  0x17   : > { %v919_v35 = vld [vmem:[%s1662_s8 + $0x10] sm:$0xff]  ;;  %v958_v36 = vld [vmem:[%s1663_s9 + $0x8] sm:$0xff]  ;;  %v957_v37 = vld [vmem:[%s1663_s9] sm:$0xff] }
  0x18   : > { %v960_v38 = vld [vmem:[%s1663_s9 + $0x18] sm:$0xff]  ;;  %v959_v39 = vld [vmem:[%s1663_s9 + $0x10] sm:$0xff]  ;;  %v962_v40 = vld [vmem:[%s1663_s9 + $0x28] sm:$0xff] }
  0x19   : > { %v961_v41 = vld [vmem:[%s1663_s9 + $0x20] sm:$0xff]  ;;  %v964_v42 = vld [vmem:[%s1663_s9 + $0x38] sm:$0xff]  ;;  %v963_v43 = vld [vmem:[%s1663_s9 + $0x30] sm:$0xff] }
  0x1a   : > { %505 = vperm.xlu1 %1314, %v483_v7   ;;  %616 = vperm.xlu0 %1313, %v493_v8   ;;  %v1052_v44 = vld [vmem:[%s1665_s11] sm:$0x1]  ;;  %v1139_v46 = vld [vmem:[%s1665_s11 + $0x1] sm:$0x1]  ;;  %v567_v7 = vsub.s32 1, %v463_v52  ;;  %v521_v8 = vsub.s32 0, %v463_v52 }
  0x1b   : > { %v1044_v45 = vld [vmem:[%s1664_s10] sm:$0x1]  ;;  %v1131_v47 = vld [vmem:[%s1664_s10 + $0x1] sm:$0x1] }
  0x1c   : > { %v453_v61 = vld [vmem:[%s441_s18] sm:$0xff] }
  0x1e   : > { %611 = vperm.xlu1 %1314, %v492_v9   ;;  %552 = vperm.xlu0 %1313, %v487_v10   ;;  %v571_v9 = vsub.s32 5, %v463_v52  ;;  %v525_v10 = vsub.s32 4, %v463_v52 }
  0x22   : > { %500 = vperm.xlu1 %1314, %v482_v11   ;;  %670 = vperm.xlu0 %1313, %v497_v12  }
  0x26   : > { %606 = vperm.xlu1 %1314, %v491_v13   ;;  %547 = vperm.xlu0 %1313, %v486_v14  }
  0x2a   : > { %601 = vperm.xlu1 %1314, %v490_v15   ;;  %665 = vperm.xlu0 %1313, %v496_v16  }
  0x2e   : > { %728 = vperm.xlu1 %1314, %v710_v17   ;;  %660 = vperm.xlu0 %1313, %v495_v18  }
  0x32   : > { %723 = vperm.xlu1 %1314, %v709_v19   ;;  %655 = vperm.xlu0 %1313, %v494_v20  }
  0x36   : > { %718 = vperm.xlu1 %1314, %v708_v21   ;;  %760 = vperm.xlu0 %1313, %v742_v22   ;;  %v621_v21 = vsub.s32 2, %v463_v52 }
  0x3a   : > { %713 = vperm.xlu1 %1314, %v707_v23   ;;  %755 = vperm.xlu0 %1313, %v741_v24  }
  0x3e   : > { %745 = vperm.xlu1 %1314, %v739_v25   ;;  %750 = vperm.xlu0 %1313, %v740_v26   ;;  %v625_v26 = vsub.s32 6, %v463_v52 }
  0x42   : > { %896 = vperm.xlu1 %1314, %v886_v27   ;;  %891 = vperm.xlu0 %1313, %v885_v28  }
  0x46   : > { %923 = vperm.xlu1 %1314, %v917_v30   ;;  %901 = vperm.xlu0 %1313, %v887_v31  }
  0x4a   : > { %906 = vperm.xlu1 %1314, %v888_v32   ;;  %928 = vperm.xlu0 %1313, %v918_v33   ;;  %v675_v33 = vsub.s32 3, %v463_v52 }
  0x4e   : > { %938 = vperm.xlu1 %1314, %v920_v34   ;;  %933 = vperm.xlu0 %1313, %v919_v35   ;;  %v679_v34 = vsub.s32 7, %v463_v52 }
  0x52   : > { %1005 = vperm.xlu1 %1314, %v958_v36   ;;  %1000 = vperm.xlu0 %1313, %v957_v37  }
  0x56   : > { %1015 = vperm.xlu1 %1314, %v960_v38   ;;  %1010 = vperm.xlu0 %1313, %v959_v39  }
  0x5a   : > { %1092 = vperm.xlu1 %1314, %v962_v40   ;;  %1087 = vperm.xlu0 %1313, %v961_v41  }
  0x5e   : > { %1102 = vperm.xlu1 %1314, %v964_v42   ;;  %1097 = vperm.xlu0 %1313, %v963_v43  }
  0x62   : > { %1055 = vperm.xlu1 %1314, %v1052_v44   ;;  %1047 = vperm.xlu0 %1313, %v1044_v45  }
  0x66   : > { %1142 = vperm.xlu1 %1314, %v1139_v46   ;;  %1134 = vperm.xlu0 %1313, %v1131_v47  }
  0x89   : > { %v516_v53 = vpop.permute.xlu1 %515  ;;  %v458_v54 = vpop.permute.xlu0 %457 }
  0x8a   : > { %v465_v60 = vrot.slane %v458_v54, %v464_v55 }
  0x8c   : > { %v467_v2 = vmul.f32 %v465_v60, %v453_v61 }
  0x8d   : > { %v563_v56 = vpop.permute.xlu1 %562  ;;  %v472_v57 = vpop.permute.xlu0 %471 }
  0x8e   : > { %v479_v62 = vrot.slane %v472_v57, %v464_v55 }
  0x90   : > { %v1578_v3 = vadd.f32 %v479_v62, %v467_v2 }
  0x91   : > { %v558_v63 = vpop.permute.xlu1 %557  ;;  %v511_v0 = vpop.permute.xlu0 %510 }
  0x92   : > { %v971_v13 = vrot.slane %v1578_v3, %v1582_v6  ;;  %v568_v14 = vrot.slane %v1578_v3, %v567_v7  ;;  %v522_v15 = vrot.slane %v1578_v3, %v521_v8  ;;  %v572_v18 = vrot.slane %v1578_v3, %v571_v9 }
  0x93   : > { %v526_v19 = vrot.slane %v1578_v3, %v525_v10  ;;  %v622_v35 = vrot.slane %v1578_v3, %v621_v21  ;;  %v626_v38 = vrot.slane %v1578_v3, %v625_v26  ;;  %v676_v43 = vrot.slane %v1578_v3, %v675_v33 }
  0x94   : > { %v972_v16 = vcombine.high %v971_v13, %v971_v13  ;;  %v979_v17 = vrot.slane %v971_v13, %v1582_v6  ;;  %v578_v27 = vrot.slane %v568_v14, %v567_v7  ;;  %v532_v28 = vrot.slane %v522_v15, %v521_v8 }
  0x95   : > { %v1580_v4 = vpop.permute.xlu1 %505  ;;  %v617_v5 = vpop.permute.xlu0 %616  ;;  %v582_v31 = vrot.slane %v572_v18, %v567_v7  ;;  %v536_v32 = vrot.slane %v526_v19, %v521_v8  ;;  %v680_v44 = vrot.slane %v1578_v3, %v679_v34  ;;  %v632_v47 = vrot.slane %v622_v35, %v621_v21 }
  0x96   : > { %v986_v24 = vrot.slane %v972_v16, %v1582_v6  ;;  %v994_v25 = vcombine.high %v979_v17, %v979_v17  ;;  %v543_v39 = vmul.f32 %v532_v28, %v516_v53  ;;  %v589_v40 = vmul.f32 %v578_v27, %v563_v56 }
  0x97   : > { %v544_v41 = vmul.f32 %v536_v32, %v516_v53  ;;  %v590_v42 = vmul.f32 %v582_v31, %v563_v56  ;;  %v587_v45 = vmul.f32 %v578_v27, %v558_v63  ;;  %v541_v46 = vmul.f32 %v532_v28, %v511_v0 }
  0x98   : > { %v987_v30 = vcombine.high %v986_v24, %v986_v24  ;;  %1270 = vst.msk [vmem:[%s1594_s25 + $0x1] ss:$4 sm:$0x3] %vm1598_vm0, %v994_v25  ;;  %v636_v50 = vrot.slane %v626_v38, %v621_v21  ;;  %v588_v51 = vmul.f32 %v582_v31, %v558_v63  ;;  %v542_v52 = vmul.f32 %v536_v32, %v511_v0 }
  0x99   : > { %v612_v11 = vpop.permute.xlu1 %611  ;;  %v553_v12 = vpop.permute.xlu0 %552  ;;  %v597_v54 = vadd.f32 %v589_v40, %v543_v39  ;;  %v598_v55 = vadd.f32 %v590_v42, %v544_v41  ;;  %v686_v58 = vrot.slane %v676_v43, %v675_v33  ;;  %v690_v59 = vrot.slane %v680_v44, %v675_v33 }
  0x9a   : > { %993 = vst.msk [vmem:[%s1594_s25] ss:$4 sm:$0x3] %vm1598_vm0, %v987_v30  ;;  %v641_v57 = vmul.f32 %v632_v47, %v612_v11  ;;  %v595_v60 = vadd.f32 %v587_v45, %v541_v46  ;;  %v643_v53 = vmul.f32 %v632_v47, %v617_v5  ;;  %v642_v56 = vmul.f32 %v636_v50, %v612_v11 }
  0x9b   : > { %v585_v61 = vmul.f32 %v578_v27, %v553_v12  ;;  %v644_v2 = vmul.f32 %v636_v50, %v617_v5  ;;  %v586_v7 = vmul.f32 %v582_v31, %v553_v12  ;;  %v596_v10 = vadd.f32 %v588_v51, %v542_v52 }
  0x9c   : > { %v539_v13 = vmul.f32 %v532_v28, %v1580_v4  ;;  %v540_v63 = vmul.f32 %v536_v32, %v1580_v4  ;;  %v651_v0 = vadd.f32 %v643_v53, %v597_v54  ;;  %v649_v15 = vadd.f32 %v641_v57, %v595_v60 }
  0x9d   : > { %v1602_v22 = vpop.permute.xlu1 %500  ;;  %v671_v23 = vpop.permute.xlu0 %670  ;;  %v652_v14 = vadd.f32 %v644_v2, %v598_v55  ;;  %v650_v18 = vadd.f32 %v642_v56, %v596_v10 }
  0x9e   : > { %v697_v8 = vmul.f32 %v686_v58, %v671_v23  ;;  %v698_v9 = vmul.f32 %v690_v59, %v671_v23  ;;  %v593_v19 = vadd.f32 %v585_v61, %v539_v13  ;;  %v594_v5 = vadd.f32 %v586_v7, %v540_v63 }
  0x9f   : > { %v538_v12 = vmul.f32 %v536_v32, %v1602_v22  ;;  %v537_v30 = vmul.f32 %v532_v28, %v1602_v22 }
  0xa0   : > { %v705_v23 = vadd.f32 %v697_v8, %v651_v0  ;;  %v706_v26 = vadd.f32 %v698_v9, %v652_v14 }
  0xa1   : > { %v607_v36 = vpop.permute.xlu1 %606  ;;  %v548_v37 = vpop.permute.xlu0 %547 }
  0xa2   : > { %v639_v16 = vmul.f32 %v632_v47, %v607_v36  ;;  %v584_v17 = vmul.f32 %v582_v31, %v548_v37  ;;  %v640_v33 = vmul.f32 %v636_v50, %v607_v36  ;;  %v583_v4 = vmul.f32 %v578_v27, %v548_v37 }
  0xa4   : > { %v647_v35 = vadd.f32 %v639_v16, %v593_v19  ;;  %v592_v38 = vadd.f32 %v584_v17, %v538_v12  ;;  %v648_v52 = vadd.f32 %v640_v33, %v594_v5  ;;  %v591_v54 = vadd.f32 %v583_v4, %v537_v30  ;;  %v779_v19 = vld [vmem:[%s1660_s6] sm:$0xff] }
  0xa5   : > { %v602_v48 = vpop.permute.xlu1 %601  ;;  %v666_v49 = vpop.permute.xlu0 %665 }
  0xa6   : > { %v695_v11 = vmul.f32 %v686_v58, %v666_v49  ;;  %v696_v21 = vmul.f32 %v690_v59, %v666_v49  ;;  %v638_v34 = vmul.f32 %v636_v50, %v602_v48  ;;  %v637_v40 = vmul.f32 %v632_v47, %v602_v48 }
  0xa8   : > { %v703_v42 = vadd.f32 %v695_v11, %v649_v15  ;;  %v704_v43 = vadd.f32 %v696_v21, %v650_v18  ;;  %v646_v22 = vadd.f32 %v638_v34, %v592_v38  ;;  %v645_v55 = vadd.f32 %v637_v40, %v591_v54  ;;  %v781_v11 = vld [vmem:[%s1660_s6 + $0x10] sm:$0xff]  ;;  %v780_v21 = vld [vmem:[%s1660_s6 + $0x8] sm:$0xff] }
  0xa9   : > { %v729_v62 = vpop.permute.xlu1 %728  ;;  %v661_v1 = vpop.permute.xlu0 %660 }
  0xaa   : > { %v737_v39 = vmul.f32 %v729_v62, %v705_v23  ;;  %v738_v31 = vmul.f32 %v729_v62, %v706_v26  ;;  %v693_v41 = vmul.f32 %v686_v58, %v661_v1  ;;  %v694_v46 = vmul.f32 %v690_v59, %v661_v1 }
  0xac   : > { %v701_v57 = vadd.f32 %v693_v41, %v647_v35  ;;  %v702_v60 = vadd.f32 %v694_v46, %v648_v52 }
  0xad   : > { %v724_v24 = vpop.permute.xlu1 %723  ;;  %v656_v25 = vpop.permute.xlu0 %655 }
  0xae   : > { %v692_v49 = vmul.f32 %v690_v59, %v656_v25  ;;  %v691_v28 = vmul.f32 %v686_v58, %v656_v25  ;;  %v735_v27 = vmul.f32 %v724_v24, %v703_v42  ;;  %v736_v36 = vmul.f32 %v724_v24, %v704_v43  ;;  %v782_v24 = vld [vmem:[%s1660_s6 + $0x18] sm:$0xff] }
  0xb0   : > { %v700_v53 = vadd.f32 %v692_v49, %v646_v22  ;;  %v699_v62 = vadd.f32 %v691_v28, %v645_v55 }
  0xb1   : > { %v719_v44 = vpop.permute.xlu1 %718  ;;  %v761_v45 = vpop.permute.xlu0 %760 }
  0xb2   : > { %v769_v32 = vadd.f32 %v761_v45, %v737_v39  ;;  %v770_v51 = vadd.f32 %v761_v45, %v738_v31  ;;  %v733_v59 = vmul.f32 %v719_v44, %v701_v57  ;;  %v734_v1 = vmul.f32 %v719_v44, %v702_v60 }
  0xb4   : > { %v778_v37 = vmax.f32 %v770_v51, 0.0  ;;  %v777_v50 = vmax.f32 %v769_v32, 0.0 }
  0xb5   : > { %v714_v47 = vpop.permute.xlu1 %713  ;;  %v756_v48 = vpop.permute.xlu0 %755 }
  0xb6   : > { %v767_v56 = vadd.f32 %v756_v48, %v735_v27  ;;  %v768_v61 = vadd.f32 %v756_v48, %v736_v36  ;;  %820 = vmatprep.subr.mxu0 %v778_v37  ;;  %1277 = vmatprep.subr.mxu1 %v778_v37  ;;  %v732_v2 = vmul.f32 %v714_v47, %v700_v53 }
  0xb7   : > { %821 = vmatpush1.msra.mxu0 %v777_v50  ;;  %1281 = vmatpush1.msra.mxu1 %v777_v50  ;;  %v731_v8 = vmul.f32 %v714_v47, %v699_v62 }
  0xb8   : > { %v775_v58 = vmax.f32 %v767_v56, 0.0  ;;  %v776_v7 = vmax.f32 %v768_v61, 0.0 }
  0xb9   : > { %v746_v9 = vpop.permute.xlu1 %745  ;;  %v751_v10 = vpop.permute.xlu0 %750 }
  0xba   : > { %v764_v13 = vadd.f32 %v746_v9, %v732_v2  ;;  %v765_v63 = vadd.f32 %v751_v10, %v733_v59  ;;  %v766_v0 = vadd.f32 %v751_v10, %v734_v1  ;;  %822 = vmatprep.subr.mxu0 %v776_v7  ;;  %v763_v14 = vadd.f32 %v746_v9, %v731_v8 }
  0xbb   : > { %1278 = vmatprep.subr.mxu1 %v776_v7  ;;  %823 = vmatpush1.msra.mxu0 %v775_v58 }
  0xbc   : > { %v773_v15 = vmax.f32 %v765_v63, 0.0  ;;  %v774_v16 = vmax.f32 %v766_v0, 0.0  ;;  %1282 = vmatpush1.msra.mxu1 %v775_v58  ;;  %v772_v17 = vmax.f32 %v764_v13, 0.0  ;;  %v771_v18 = vmax.f32 %v763_v14, 0.0 }
  0xbd   : > { %v892_v25 = vpop.permute.xlu0 %891  ;;  %v897_v5 = vpop.permute.xlu1 %896 }
  0xbe   : > { %824 = vmatprep.subr.mxu0 %v774_v16  ;;  %1279 = vmatprep.subr.mxu1 %v774_v16 }
  0xbf   : > { %825 = vmatpush1.msra.mxu0 %v773_v15  ;;  %1283 = vmatpush1.msra.mxu1 %v773_v15 }
  0xc0   : > { %826 = vmatprep.subr.mxu0 %v772_v17  ;;  %1280 = vmatprep.subr.mxu1 %v772_v17 }
  0xc1   : > { %827 = vmatpush1.msra.mxu0 %v771_v18  ;;  %1284 = vmatpush1.msra.mxu1 %v771_v18  ;;  %v902_v12 = vpop.permute.xlu0 %901  ;;  %v924_v23 = vpop.permute.xlu1 %923 }
  0xc2   : > { %1266 = vmatmul.mubr.msk.f32.vlgmr.msra.gmra.mxu0 %vm783_vm1, %v779_v19  ;;  %1268 = vmatmul.mubr.msk.f32.vlgmr.msra.gmra.mxu1 %vm783_vm1, %v781_v11 }
  0xc3   : > { %866 = vmatprep.mubr.f32.mxu0 %v1340_v29  ;;  %878 = vmatprep.mubr.f32.mxu1 %v1340_v29 }
  0xc5   : > { %v929_v26 = vpop.permute.xlu0 %928  ;;  %v907_v30 = vpop.permute.xlu1 %906 }
  0xc6   : > { %1267 = vmatmul.mubr.msk.f32.gmra.mxu0 %vm783_vm1, %v780_v21  ;;  %1269 = vmatmul.mubr.msk.f32.gmra.mxu1 %vm783_vm1, %v782_v24 }
  0xc9   : > { %v934_v33 = vpop.permute.xlu0 %933  ;;  %v939_v4 = vpop.permute.xlu1 %938 }
  0xcd   : > { %v1001_v34 = vpop.permute.xlu0 %1000  ;;  %v1006_v29 = vpop.permute.xlu1 %1005 }
  0xd1   : > { %v1011_v39 = vpop.permute.xlu0 %1010  ;;  %v1016_v43 = vpop.permute.xlu1 %1015 }
  0xd5   : > { %v1088_v36 = vpop.permute.xlu0 %1087  ;;  %v1093_v48 = vpop.permute.xlu1 %1092 }
  0xd9   : > { %v1098_v9 = vpop.permute.xlu0 %1097  ;;  %v1103_v17 = vpop.permute.xlu1 %1102 }
 0x182   : > { %v862_v35 = vpop.f32.mrf.mxu0  ;;  %v874_v38 = vpop.f32.mrf.mxu1 }
 0x183   : > { %v909_v31 = vmul.f32 %v892_v25, %v862_v35  ;;  %v913_v40 = vmul.f32 %v902_v12, %v874_v38 }
 0x184   : > { %v864_v41 = vpop.f32.mrf.mxu0  ;;  %v876_v42 = vpop.f32.mrf.mxu1 }
 0x185   : > { %v910_v44 = vmul.f32 %v892_v25, %v864_v41  ;;  %v941_v45 = vadd.f32 %v924_v23, %v909_v31  ;;  %v945_v32 = vadd.f32 %v934_v33, %v913_v40  ;;  %v914_v51 = vmul.f32 %v902_v12, %v876_v42 }
 0x186   : > { %v868_v46 = vpop.f32.mrf.mxu0  ;;  %v880_v49 = vpop.f32.mrf.mxu1 }
 0x187   : > { %v911_v52 = vmul.f32 %v897_v5, %v868_v46  ;;  %v915_v54 = vmul.f32 %v907_v30, %v880_v49  ;;  %v942_v27 = vadd.f32 %v924_v23, %v910_v44  ;;  %v949_v37 = vmax.f32 %v941_v45, 0.0 }
 0x188   : > { %v870_v22 = vpop.f32.mrf.mxu0  ;;  %v882_v28 = vpop.f32.mrf.mxu1  ;;  %v953_v60 = vmax.f32 %v945_v32, 0.0  ;;  %v946_v53 = vadd.f32 %v934_v33, %v914_v51 }
 0x189   : > { %v943_v50 = vadd.f32 %v929_v26, %v911_v52  ;;  %v947_v55 = vadd.f32 %v939_v4, %v915_v54  ;;  %v912_v57 = vmul.f32 %v897_v5, %v870_v22  ;;  %v916_v47 = vmul.f32 %v907_v30, %v882_v28  ;;  %v1048_v22 = vpop.permute.xlu0 %1047 }
 0x18a   : > { %v950_v56 = vmax.f32 %v942_v27, 0.0  ;;  %v1018_v62 = vmul.f32 %v1001_v34, %v949_v37  ;;  %v1105_v2 = vmul.f32 %v1088_v36, %v949_v37  ;;  %v1022_v10 = vmul.f32 %v1011_v39, %v953_v60 }
 0x18b   : > { %v951_v61 = vmax.f32 %v943_v50, 0.0  ;;  %v944_v59 = vadd.f32 %v929_v26, %v912_v57  ;;  %v948_v1 = vadd.f32 %v939_v4, %v916_v47  ;;  %v955_v8 = vmax.f32 %v947_v55, 0.0  ;;  %v1056_v47 = vpop.permute.xlu1 %1055 }
 0x18c   : > { %v954_v13 = vmax.f32 %v946_v53, 0.0  ;;  %v1109_v0 = vmul.f32 %v1098_v9, %v953_v60  ;;  %v1019_v14 = vmul.f32 %v1001_v34, %v950_v56  ;;  %v1106_v18 = vmul.f32 %v1088_v36, %v950_v56 }
 0x18d   : > { %v1020_v58 = vmul.f32 %v1006_v29, %v951_v61  ;;  %v1107_v7 = vmul.f32 %v1093_v48, %v951_v61  ;;  %v952_v63 = vmax.f32 %v944_v59, 0.0  ;;  %v956_v21 = vmax.f32 %v948_v1, 0.0  ;;  %v1135_v61 = vpop.permute.xlu0 %1134 }
 0x18e   : > { %v1024_v24 = vmul.f32 %v1016_v43, %v955_v8  ;;  %v1111_v5 = vmul.f32 %v1103_v17, %v955_v8  ;;  %v1023_v23 = vmul.f32 %v1011_v39, %v954_v13  ;;  %v1110_v26 = vmul.f32 %v1098_v9, %v954_v13 }
 0x18f   : > { %v1026_v15 = vadd.f32 %v1020_v58, %v1018_v62  ;;  %v1113_v16 = vadd.f32 %v1107_v7, %v1105_v2  ;;  %v1021_v19 = vmul.f32 %v1006_v29, %v952_v63  ;;  %v1108_v11 = vmul.f32 %v1093_v48, %v952_v63  ;;  %v1143_v8 = vpop.permute.xlu1 %1142 }
 0x190   : > { %v1025_v38 = vmul.f32 %v1016_v43, %v956_v21  ;;  %v1112_v34 = vmul.f32 %v1103_v17, %v956_v21 }
 0x191   : > { %v1027_v25 = vadd.f32 %v1026_v15, %v1022_v10  ;;  %v1114_v12 = vadd.f32 %v1113_v16, %v1109_v0  ;;  %v1035_v30 = vadd.f32 %v1021_v19, %v1019_v14  ;;  %v1122_v33 = vadd.f32 %v1108_v11, %v1106_v18 }
 0x193   : > { %v1028_v4 = vadd.f32 %v1027_v25, %v1024_v24  ;;  %v1115_v35 = vadd.f32 %v1114_v12, %v1111_v5  ;;  %v1036_v31 = vadd.f32 %v1035_v30, %v1023_v23  ;;  %v1123_v40 = vadd.f32 %v1122_v33, %v1110_v26 }
 0x195   : > { %v1029_v41 = vrot.slane %v1028_v4, 4  ;;  %v1116_v42 = vrot.slane %v1115_v35, 4  ;;  %v1037_v44 = vadd.f32 %v1036_v31, %v1025_v38  ;;  %v1124_v29 = vadd.f32 %v1123_v40, %v1112_v34 }
 0x197   : > { %v1030_v45 = vadd.f32 %v1029_v41, %v1028_v4  ;;  %v1117_v46 = vadd.f32 %v1116_v42, %v1115_v35  ;;  %v1038_v49 = vrot.slane %v1037_v44, 4  ;;  %v1125_v32 = vrot.slane %v1124_v29, 4 }
 0x199   : > { %v1031_v51 = vrot.slane %v1030_v45, 2  ;;  %v1118_v52 = vrot.slane %v1117_v46, 2  ;;  %v1039_v39 = vadd.f32 %v1038_v49, %v1037_v44  ;;  %v1126_v54 = vadd.f32 %v1125_v32, %v1124_v29 }
 0x19b   : > { %v1032_v28 = vadd.f32 %v1031_v51, %v1030_v45  ;;  %v1119_v27 = vadd.f32 %v1118_v52, %v1117_v46  ;;  %v1040_v36 = vrot.slane %v1039_v39, 2  ;;  %v1127_v43 = vrot.slane %v1126_v54, 2 }
 0x19d   : > { %v1033_v37 = vrot.slane %v1032_v28, 1  ;;  %v1120_v50 = vrot.slane %v1119_v27, 1  ;;  %v1041_v55 = vadd.f32 %v1040_v36, %v1039_v39  ;;  %v1128_v57 = vadd.f32 %v1127_v43, %v1126_v54 }
 0x19f   : > { %v1034_v48 = vadd.f32 %v1033_v37, %v1032_v28  ;;  %v1121_v60 = vadd.f32 %v1120_v50, %v1119_v27  ;;  %v1042_v53 = vrot.slane %v1041_v55, 1  ;;  %v1129_v56 = vrot.slane %v1128_v57, 1 }
 0x1a1   : > { %v1050_v59 = vadd.f32 %v1048_v22, %v1034_v48  ;;  %v1137_v62 = vadd.f32 %v1135_v61, %v1121_v60  ;;  %v1043_v1 = vadd.f32 %v1042_v53, %v1041_v55  ;;  %v1130_v2 = vadd.f32 %v1129_v56, %v1128_v57 }
 0x1a3   : > { %v1051_v58 = vadd.f32 %v1048_v22, %v1043_v1  ;;  %v1138_v7 = vadd.f32 %v1135_v61, %v1130_v2  ;;  %v1058_v9 = vmul.f32 %v1056_v47, %v1050_v59  ;;  %v1145_v10 = vmul.f32 %v1143_v8, %v1137_v62 }
 0x1a5   : > { %v1059_v13 = vmul.f32 %v1056_v47, %v1051_v58  ;;  %v1146_v63 = vmul.f32 %v1143_v8, %v1138_v7 }
 0x1a7   : > { %v1062_v0 = vcombine.low %v1058_v9, %v1059_v13  ;;  %v1149_v14 = vcombine.low %v1145_v10, %v1146_v63 }
 0x1a9   : > { %v1063_v15 = vrot.slane %v1062_v0, 7  ;;  %v1151_v16 = vadd.f32 %v1149_v14, %v1578_v3 }
 0x1ab   : > { %v1065_v17 = vadd.f32 %v1063_v15, %v1578_v3  ;;  %v1159_v18 = vrot.slane %v1151_v16, %v1582_v6 }
 0x1ad   : > { %v1073_v19 = vrot.slane %v1065_v17, %v1582_v6  ;;  %v1166_v11 = vrot.slane %v1159_v18, %v1582_v6 }
 0x1af   : > { %v1074_v21 = vcombine.high %v1073_v19, %v1073_v19  ;;  %1272 = vst.msk [vmem:[%s1594_s25 + $0x3] ss:$4 sm:$0x3] %vm1598_vm0, %v1166_v11 }
 0x1b1   : > { %v1081_v24 = vrot.slane %v1074_v21, %v1582_v6 }
 0x1b3   : > { %1271 = vst.msk [vmem:[%s1594_s25 + $0x2] ss:$4 sm:$0x3] %vm1598_vm0, %v1081_v24 }
 0x1b4 PF: > { %s22_s23 = sadd.s32 1, %s1337_s23   ;;  %s1669_s21 = smov %s1333_s22 }
 0x1b5   : > { %p19_p5 = scmp.ge.s32.totalorder %s22_s23, 4   ;;  %s1670_s22 = smov %s1672_s24 }
 0x1b7   :  { %21 = sbr.rel (!%p19_p5) target bundleno = 2 (0x2), region = 101 }

</bundles_post_ra>
